<compile_context>
chip_gen: v7x
topology: tpu7x:2x2x1
jax: 0.10.0
libtpu: 0.0.40
codegen_flags: <defaults>
</compile_context>

<pallas_src>
import jax
import jax.numpy as jnp
import numpy as np
from jax.experimental import pallas as pl
from jax.experimental.pallas import tpu as pltpu


def _pool_repeat_kernel(x_ref, sel_ref, out_ref):
    """One grid step = B batch elements.

    x_ref  : (B*C*Ho, 2*W) f32 -- row (b*C + c)*Ho + ho = [in row 2*ho | in row 2*ho+1]
    sel_ref: (W, Wo)       f32 -- one-hot even-lane selector, sel[2*j, j] = 1
    out_ref: (B, r, C*Ho, Wo) f32
    """
    rows, two_w = x_ref.shape
    W = two_w // 2
    B, r, ch_rows, Wo = out_ref.shape

    # Vertical (h) pairwise max: two 128-aligned lane slices + one VPU max.
    vmax = jnp.maximum(x_ref[:, 0:W], x_ref[:, W:two_w])            # (rows, W)

    # Horizontal neighbour max: XLU lane rotation by W-1 (== -1 mod W, so
    # column j sees column j+1), then a single one-hot matmul on the otherwise
    # idle MXU selects the even lanes (stride-2 downsample). Each output column
    # has exactly one weight-1 lane, so the result is numerically exact for
    # finite inputs.
    shifted = pltpu.roll(vmax, W - 1, axis=1)                       # (rows, W)
    hmax = jnp.maximum(vmax, shifted)
    pooled = jnp.dot(hmax, sel_ref[...],
                     preferred_element_type=jnp.float32)            # (rows, Wo)
    pooled = pooled.reshape(B, ch_rows, Wo).astype(out_ref.dtype)

    # Channel repeat (torch .repeat(1, r, 1, 1)): r explicit lane-dense slab
    # stores, no broadcast intermediate.
    for k in range(r):
        out_ref[:, k, :, :] = pooled


def _pick_batch_block(n_batch, max_b=8):
    """Largest divisor of n_batch that is <= max_b and keeps >= 2 grid steps."""
    if n_batch <= 1:
        return 1
    best = 1
    for b in range(1, min(max_b, n_batch // 2) + 1):
        if n_batch % b == 0:
            best = b
    return best


def enet_encoder_other_path(x_nchw, *, output_channels, downsample=True,
                            batch_block=None):
    """Matches EnetEncoderOtherPath.forward for downsample=True, Cout % Cin == 0."""
    N, C, H, W = x_nchw.shape
    if not downsample:
        # TODO(synk): non-downsample branch not exercised by this instantiation.
        raise NotImplementedError("downsample=False branch not instantiated")
    assert output_channels % C == 0, "module requires Cout to be a multiple of Cin"
    assert H % 2 == 0 and W % 2 == 0, "MaxPool2d(2, stride=2) needs even H, W"
    # Lane-dense layout requirements (aligned lane slices, unmasked stores).
    assert W % 128 == 0, "lane-dense kernel layout requires W % 128 == 0"
    r = output_channels // C
    Ho, Wo = H // 2, W // 2
    assert (C * Ho) % 8 == 0, "sublane-legal input blocks need (C*H//2) % 8 == 0"

    # Free row-major reshape: row (n*C + c)*Ho + ho holds input rows 2*ho and
    # 2*ho+1 of plane (n, c) back-to-back -> lane-dense 2-D slab.
    xr = x_nchw.reshape(N * C * Ho, 2 * W)

    # One-hot even-lane selector sel[2*j, j] = 1, built once in the wrapper and
    # passed with a constant index_map so its VMEM block is reused across all
    # grid steps (no per-step recomputation inside the kernel).
    rid = jax.lax.broadcasted_iota(jnp.int32, (W, Wo), 0)
    cid = jax.lax.broadcasted_iota(jnp.int32, (W, Wo), 1)
    sel = (rid == 2 * cid).astype(x_nchw.dtype)

    # Batch several images per grid step (the kernel is HBM-bandwidth bound:
    # big blocks amortize per-step overhead and give full-size DMAs), while
    # keeping >= 2 grid steps so the parallel axis splits across v7x's two TCs.
    B = _pick_batch_block(N) if batch_block is None else batch_block
    assert N % B == 0

    out = pl.pallas_call(
        _pool_repeat_kernel,
        out_shape=jax.ShapeDtypeStruct((N, r, C * Ho, Wo), x_nchw.dtype),
        grid=(N // B,),
        in_specs=[
            pl.BlockSpec((B * C * Ho, 2 * W), lambda n: (n, 0)),
            pl.BlockSpec((W, Wo), lambda n: (0, 0)),   # resident constant block
        ],
        out_specs=pl.BlockSpec((B, r, C * Ho, Wo), lambda n: (n, 0, 0, 0)),
        compiler_params=pltpu.CompilerParams(
            dimension_semantics=("parallel",)),
    )(xr, sel)

    # (N, r, C*Ho, Wo) -> (N, r*C, Ho, Wo); channel index k*C + c matches
    # torch.Tensor.repeat(1, r, 1, 1) semantics exactly. Free row-major reshape.
    return out.reshape(N, r * C, Ho, Wo)


if __name__ == "__main__":
    key = jax.random.PRNGKey(0)
    # input_channels=16, output_channels=32 (repeat factor 2), downsample=True.
    # Spatial dims chosen so every kernel operand / output block is lane-dense;
    # N=8 -> batch block B=4, grid=(2,).
    N, C, H, W = 8, 16, 16, 256
    Cout = 32
    x = jax.random.normal(key, (N, C, H, W), jnp.float32)

    out = jax.block_until_ready(
        enet_encoder_other_path(x, output_channels=Cout, downsample=True))

    # Pure-JAX reference mirroring the PyTorch forward.
    pooled = jax.lax.reduce_window(
        x, -jnp.inf, jax.lax.max,
        window_dimensions=(1, 1, 2, 2),
        window_strides=(1, 1, 2, 2),
        padding="VALID")
    ref = jnp.concatenate([pooled] * (Cout // C), axis=1)

    assert out.shape == ref.shape == (N, Cout, H // 2, W // 2)
    np.testing.assert_allclose(np.asarray(out), np.asarray(ref),
                               rtol=1e-6, atol=1e-6)
    print("KERNEL_OK")
</pallas_src>

<mosaic_0001>
module attributes {stable_mosaic.version = 11 : i64} {
  func.func @_pool_repeat_kernel(%arg0: i32, %arg1: memref<512x512xf32, #tpu.memory_space<vmem>>, %arg2: memref<256x128xf32, #tpu.memory_space<vmem>>, %arg3: memref<4x2x128x128xf32, #tpu.memory_space<vmem>>) attributes {dimension_semantics = [#tpu.dimension_semantics<parallel>], iteration_bounds = array<i64: 2>, scalar_prefetch = 0 : i64, scratch_operands = 0 : i64, tpu.core_type = #tpu.core_type<tc>, window_params = [{transform_indices = @transform_0, window_bounds = array<i64: 512, 512>}, {pipeline_mode = #tpu.pipeline_mode<synchronous>, transform_indices = @transform_1, window_bounds = array<i64: 256, 128>}, {transform_indices = @transform_2, window_bounds = array<i64: 4, 2, 128, 128>}]} {
    %c0 = arith.constant 0 : index
    %c0_0 = arith.constant 0 : index
    %0 = vector.load %arg1[%c0, %c0_0] : memref<512x512xf32, #tpu.memory_space<vmem>>, vector<512x256xf32>
    %c0_1 = arith.constant 0 : index
    %c256 = arith.constant 256 : index
    %1 = vector.load %arg1[%c0_1, %c256] : memref<512x512xf32, #tpu.memory_space<vmem>>, vector<512x256xf32>
    %2 = arith.maximumf %0, %1 : vector<512x256xf32>
    %c255_i32 = arith.constant 255 : i32
    %3 = tpu.dynamic_rotate %2 by %c255_i32 dim 1 : vector<512x256xf32>, i32 -> vector<512x256xf32>
    %4 = arith.maximumf %2, %3 : vector<512x256xf32>
    %c0_2 = arith.constant 0 : index
    %c0_3 = arith.constant 0 : index
    %5 = vector.load %arg2[%c0_2, %c0_3] : memref<256x128xf32, #tpu.memory_space<vmem>>, vector<256x128xf32>
    %cst = arith.constant dense<0.000000e+00> : vector<512x128xf32>
    %6 = tpu.matmul %4, %5, %cst {dimension_numbers = #tpu.dot_dimension_numbers<[1], [0], [0], [1], [0, 0, 1, 1], [], []>} : vector<512x256xf32>, vector<256x128xf32>, vector<512x128xf32> -> vector<512x128xf32>
    %7 = vector.shape_cast %6 : vector<512x128xf32> to vector<4x128x128xf32>
    %c0_4 = arith.constant 0 : index
    %c0_5 = arith.constant 0 : index
    %c0_6 = arith.constant 0 : index
    %c0_7 = arith.constant 0 : index
    %8 = vector.load %arg3[%c0_4, %c0_5, %c0_6, %c0_7] : memref<4x2x128x128xf32, #tpu.memory_space<vmem>>, vector<4x1x128x128xf32>
    %9 = vector.shape_cast %8 : vector<4x1x128x128xf32> to vector<4x128x128xf32>
    %10 = vector.shape_cast %7 : vector<4x128x128xf32> to vector<4x1x128x128xf32>
    tpu.vector_store %arg3[%c0_4, %c0_5, %c0_6, %c0_7], %10 {strides = array<i32>} : memref<4x2x128x128xf32, #tpu.memory_space<vmem>>, vector<4x1x128x128xf32>,
    %c0_8 = arith.constant 0 : index
    %c1 = arith.constant 1 : index
    %c0_9 = arith.constant 0 : index
    %c0_10 = arith.constant 0 : index
    %11 = vector.load %arg3[%c0_8, %c1, %c0_9, %c0_10] : memref<4x2x128x128xf32, #tpu.memory_space<vmem>>, vector<4x1x128x128xf32>
    %12 = vector.shape_cast %11 : vector<4x1x128x128xf32> to vector<4x128x128xf32>
    %13 = vector.shape_cast %7 : vector<4x128x128xf32> to vector<4x1x128x128xf32>
    tpu.vector_store %arg3[%c0_8, %c1, %c0_9, %c0_10], %13 {strides = array<i32>} : memref<4x2x128x128xf32, #tpu.memory_space<vmem>>, vector<4x1x128x128xf32>,
    return
  }
  func.func @transform_0(%arg0: i32) -> (i32, i32) {
    %c0_i32 = arith.constant 0 : i32
    %c0_i32_0 = arith.constant 0 : i32
    return %arg0, %c0_i32 : i32, i32
  }
  func.func @transform_1(%arg0: i32) -> (i32, i32) {
    %c0_i32 = arith.constant 0 : i32
    %c0_i32_0 = arith.constant 0 : i32
    %c0_i32_1 = arith.constant 0 : i32
    return %c0_i32, %c0_i32_0 : i32, i32
  }
  func.func @transform_2(%arg0: i32) -> (i32, i32, i32, i32) {
    %c0_i32 = arith.constant 0 : i32
    %c0_i32_0 = arith.constant 0 : i32
    %c0_i32_1 = arith.constant 0 : i32
    %c0_i32_2 = arith.constant 0 : i32
    return %arg0, %c0_i32, %c0_i32_0, %c0_i32_1 : i32, i32, i32, i32
  }
}

</mosaic_0001>

<bundles_post_ra>
// kernel: tpu_custom_call.1
= control target key start
LH: loop header
LB: loop body
LE: loop exit
PB: predicated region body
PF: predicated region fallthrough
CT: control target
= control target key end

     0   :  { %7 = vsyncpa [#allocation3], 0  ;;  %s3888_s0 = inlined_call_operand.hbm [shape: f32[1024,512], index: 0, kind: input, shape index: {}]   ;;  %s3889_s1 = inlined_call_operand.hbm [shape: f32[256,128], index: 1, kind: input, shape index: {}]   ;;  %s3890_s2 = inlined_call_operand.hbm [shape: f32[8,2,128,128], index: 2, kind: output, shape index: {}]  }
   0x1   :  { %9 = vsyncpa [#allocation3 + $0x1], 0 }
   0x2   :  { %10 = vsyncpa [#allocation6], 0 }
   0x3   :  { %11 = vsyncpa [#allocation4], 0 }
   0x4   :  { %13 = vsyncpa [#allocation4 + $0x1], 0  ;;  %s2430_s9 = smov 0   ;;  %s2432_s10 = smov 0  }
   0x5   :  { %s2434_s11 = smov 0   ;;  %s2436_s12 = smov 0  }
   0x6 LB: > { %s2451_s13 = sadd.s32 4294967295, %s2402_s12   ;;  %s1723_s14 = sadd.s32 4294967294, %s2402_s12   ;;  %s2402_s12 = sphi %s2436_s12, %s4180_s12   ;;  %s2398_s11 = sphi %s2434_s11, %s4179_s11   ;;  %s2394_s10 = sphi %s2432_s10, %s4178_s10   ;;  %s2390_s9 = sphi %s2430_s9, %s4177_s9  }
   0x7   : > { %p39_p0 = scmp.ne.s32.totalorder %s2394_s10, %s2390_s9  ;;  %p3891_p1 = scmp.eq.s32.totalorder %s2451_s13, 0 }
   0x8   : > { %p90_p3 = scmp.eq.s32.totalorder %s1723_s14, 1  ;;  %p1724_p5 = scmp.ge.s32.totalorder %s2402_s12, 1 }
   0x9   : > { %p2460_p4 = por %p3891_p1, %p39_p0  ;;  %p97_p7 = scmp.lt.s32.totalorder %s2402_s12, 3 }
   0xa   : > { %p2465_p6 = por %p90_p3, %p39_p0  ;;  %s2404_s18 = smov [#allocation5]  }
   0xb   : > { %s3985_s15 = scalar_select %p2460_p4, 1, 0 }
   0xc   : > { %s3986_s16 = scalar_select %p2465_p6, 1, 0 }
   0xd   : > { %p2470_p8 = pnand %p1724_p5, %p97_p7  ;;  %s109_s19 = sshll.u32 %s2404_s18, 4  ;;  %s2474_s19 = int_to_ptr.vmem [resolvable:$true] %s109_s19 }
   0xe   : > { %s2486_s21 = sadd.s32 1, %s2402_s12   ;;  %s26_s22 = sadd.s32 1, %s2398_s11 }
   0xf   : > { %s3987_s17 = scalar_select %p2470_p8, 1, 0 }
  0x10   : > { %p1897_p9 = pneg %p2470_p8  ;;  %s23_s23 = ssub.s32 %s2402_s12, %s2486_s21 }
  0x11   : > { %s2274_s26 = scalar_lea.hbm %s3889_s1, 4096 }
  0x12   : > { %p2481_p11 = pnand %p1897_p9, %p3891_p1  ;;  %p2275_p12 = scmp.ne.s32.totalorder %s3889_s1, %s2274_s26 }
  0x13   : > { %p2281_p5 = scmp.lt.u32.totalorder %s2274_s26, %s3889_s1 }
  0x14   : > { %p2276_p13 = pneg %p2481_p11 }
  0x16   : > { %p2277_p0 = pnand %p2276_p13, %p2275_p12 }
  0x18   : > { %p2278_p3 = pneg %p2277_p0 }
  0x1a   : > { %p2283_p7 = pnand %p2281_p5, %p2278_p3 }
  0x1c   : > { %2286 = shalt.err (!%p2283_p7)
}
  0x1d   : > { %s2287_s3 = scalar_lea.vmem %s2474_s19, 4096  ;;  %p2295_p2 = scmp.lt.s32.totalorder %s2474_s19, %s2474_s19 }
  0x1e   : > { %p2288_p9 = scmp.ne.s32.totalorder %s2474_s19, %s2287_s3  ;;  %p2296_p6 = scmp.lt.s32.totalorder %s2287_s3, %s2287_s3 }
  0x20   : > { %p2290_p10 = pnand %p2288_p9, %p2276_p13  ;;  %p2297_p4 = por %p2296_p6, %p2295_p2 }
  0x22   : > { %p2291_p1 = pneg %p2290_p10 }
  0x24   : > { %p2298_p8 = pnand %p2297_p4, %p2291_p1 }
  0x26   : > { %2301 = shalt.err (!%p2298_p8)
}
  0x27   : > { %s2405_s4 = smov 128   ;;  %s2406_s5 = smov 8  }
  0x28   : > { %1900 = dma.hbm_to_vmem [thread:$0]  (!%p2481_p11), %s3889_s1, 4096, %s2474_s19, [#allocation6], %s2405_s4, %s2405_s4, %s2406_s5  }
  0x29   : > { %p24_p2 = scmp.eq.s32.totalorder %s23_s23, 0  ;;  %p33_p1 = scmp.ne.s32.totalorder %s2398_s11, %s2394_s10 }
  0x2a   : > { %p34_p4 = scmp.eq.s32.totalorder %s2402_s12, 0  ;;  %p1910_p6 = scmp.lt.s32.totalorder %s2402_s12, 2 }
  0x2b   : > { %s2517_s8 = scalar_select %p24_p2, %s2398_s11, %s26_s22  }
  0x2c   : > { %p35_p8 = por %p34_p4, %p33_p1  ;;  %p3989_p10 = scmp.eq.s32.totalorder %s2451_s13, 1 }
  0x2d   : > { %s123_s18 = sand.u32 1, %s2398_s11   ;;  %s1806_s24 = sshll.u32 %s2402_s12, 15 }
  0x2e   : > { %p2521_p12 = por %p3989_p10, %p33_p1  ;;  %s1727_s25 = sshll.u32 %s123_s18, 11 }
  0x2f   : > { %s2530_s27 = scalar_lea.hbm %s3888_s0, %s1806_s24  ;;  %s127_s19 = scalar_lea.vmem [#allocation2], %s1727_s25 }
  0x30   : > { %s135_s22 = sshll.u32 %s127_s19, 4  ;;  %p2532_p11 = pnand %p1910_p6, %p35_p8  ;;  %s2536_s22 = int_to_ptr.vmem [resolvable:$true] %s135_s22 }
  0x31   : > { %s2538_s28 = scalar_lea.sflag [#allocation3], %s123_s18  ;;  %s2302_s29 = scalar_lea.hbm %s2530_s27, 32768 }
  0x32   : > { %p2303_p13 = scmp.ne.s32.totalorder %s2530_s27, %s2302_s29  ;;  %p2304_p0 = pneg %p2532_p11 }
  0x33   : > { %s2307_s4 = scalar_lea.hbm %s3888_s0, 65536  ;;  %p2308_p7 = scmp.lt.u32.totalorder %s2530_s27, %s3888_s0 }
  0x34   : > { %p2305_p3 = pnand %p2304_p0, %p2303_p13  ;;  %p2309_p9 = scmp.lt.u32.totalorder %s2307_s4, %s2302_s29 }
  0x35   : > { %p2311_p1 = scmp.lt.u32.totalorder %s2302_s29, %s2530_s27 }
  0x36   : > { %p2306_p5 = pneg %p2305_p3  ;;  %p2310_p2 = por %p2309_p9, %p2308_p7 }
  0x38   : > { %p2312_p4 = por %p2311_p1, %p2310_p2 }
  0x3a   : > { %p2313_p6 = pnand %p2312_p4, %p2306_p5 }
  0x3c   : > { %2316 = shalt.err (!%p2313_p6)
}
  0x3d   : > { %s2317_s7 = scalar_lea.vmem %s2536_s22, 32768  ;;  %s2407_s18 = smov [#allocation2]  }
  0x3e   : > { %p2318_p8 = scmp.ne.s32.totalorder %s2536_s22, %s2317_s7  ;;  %s2322_s24 = sshll.u32 %s2407_s18, 4  ;;  %s2323_s24 = int_to_ptr.vmem [resolvable:$false] %s2322_s24 }
  0x3f   : > { %s2324_s25 = scalar_lea.vmem %s2323_s24, 65536  ;;  %p2325_p3 = scmp.lt.s32.totalorder %s2536_s22, %s2323_s24 }
  0x40   : > { %p2320_p10 = pnand %p2318_p8, %p2304_p0  ;;  %p2326_p7 = scmp.lt.s32.totalorder %s2324_s25, %s2317_s7 }
  0x42   : > { %p2321_p13 = pneg %p2320_p10  ;;  %p2327_p9 = por %p2326_p7, %p2325_p3 }
  0x44   : > { %p2328_p2 = pnand %p2327_p9, %p2321_p13 }
  0x46   : > { %2331 = shalt.err (!%p2328_p2)
}
  0x47   : > { %s2408_s20 = smov 512   ;;  %s2409_s26 = smov 32  }
  0x48   : > { %1904 = dma.hbm_to_vmem [thread:$0]  (!%p2532_p11), %s2530_s27, 32768, %s2536_s22, %s2538_s28, %s2408_s20, %s2408_s20, %s2409_s26  }
  0x49   : > { %p3992_p0 = scmp.ne.s32.totalorder %s3987_s17, 0 }
  0x4b   : > { %147 = sbr.rel (%p3992_p0) target bundleno = 574 (0x23e), region = 28 }
  0x52   : > { %s2569_s19 = sand.u32 1, %s2394_s10   ;;  %p3993_p5 = scmp.ne.s32.totalorder %s3985_s15, 0 }
  0x53   : > { %s1732_s29 = sshll.u32 %s2569_s19, 11  ;;  %s150_s30 = scalar_lea.sflag [#allocation3], %s2569_s19 }
  0x54   : > { %s2573_s3 = scalar_lea.vmem [#allocation2], %s1732_s29 }
  0x55   : > { %2377 = dma.done.wait (%p3993_p5), %s150_s30, 32768  }
  0x56   : > { %2379 = vsyncadd (%p3993_p5), %s150_s30, 4294934528  ;;  %p3994_p11 = scmp.eq.s32.totalorder %s2451_s13, 0 }
  0x58   : > { %2381 = dma.done.wait (%p3994_p11), [#allocation6], 4096   ;;  %p3995_p1 = pmov %p3994_p11 }
  0x59   : > { %v3894_v0 = vmov 0.0|0.0   ;;  %v182_v1 = vld [vmem:[%s2573_s3 + $0x20] sm:$0xff]  ;;  %v310_v3 = vld [vmem:[%s2573_s3 + $0x30] sm:$0xff]  ;;  %v183_v11 = vld [vmem:[%s2573_s3 + $0x28] sm:$0xff]  ;;  %s2411_s15 = smov 127   ;;  %s1734_s17 = sshll.u32 %s2569_s19, 10 }
  0x5a   : > { %2383 = vsyncadd (%p3995_p1), [#allocation6], 4294963200  ;;  %1809 = vmatprep.subr.bf16.mxu0 %v3894_v0  ;;  %1857 = vmatprep.subr.bf16.mxu1 %v3894_v0  ;;  %v246_v2 = vld [vmem:[%s2573_s3 + $0x420] sm:$0xff]  ;;  %v374_v4 = vld [vmem:[%s2573_s3 + $0x430] sm:$0xff]  ;;  %v2589_v5 = vmax.f32 %v182_v1, %v310_v3  ;;  %s3707_s27 = scalar_lea.vmem [#allocation7], %s1734_s17  ;;  %s1808_s22 = sshll.u32 %s2451_s13, 14 }
  0x5b   : > { %v180_v6 = vld [vmem:[%s2573_s3] sm:$0xff]  ;;  %v2593_v8 = vmax.f32 %v246_v2, %v374_v4  ;;  %v308_v9 = vld [vmem:[%s2573_s3 + $0x10] sm:$0xff]  ;;  %v247_v14 = vld [vmem:[%s2573_s3 + $0x428] sm:$0xff]  ;;  %s1640_s23 = sshll.u32 %s3707_s27, 4  ;;  %s3838_s5 = scalar_lea.hbm %s3890_s2, %s1808_s22  ;;  %s3840_s23 = int_to_ptr.vmem [resolvable:$true] %s1640_s23 }
  0x5c   : > { %v244_v7 = vld [vmem:[%s2573_s3 + $0x400] sm:$0xff]  ;;  %v372_v10 = vld [vmem:[%s2573_s3 + $0x410] sm:$0xff]  ;;  %v2598_v12 = vmax.f32 %v180_v6, %v308_v9  ;;  %v311_v15 = vld [vmem:[%s2573_s3 + $0x38] sm:$0xff]  ;;  %s1626_s13 = scalar_lea.sflag [#allocation4], %s2569_s19  ;;  %s2332_s6 = scalar_lea.vmem %s3840_s23, 16384 }
  0x5d   : > { %v2600_v13 = vmax.f32 %v244_v7, %v372_v10  ;;  %v375_v16 = vld [vmem:[%s2573_s3 + $0x438] sm:$0xff]  ;;  %v1964_v17 = vpack.i.bf16 %v2593_v8, %v2589_v5  ;;  %v2607_v18 = vmax.f32 %v183_v11, %v311_v15  ;;  %v181_v20 = vld [vmem:[%s2573_s3 + $0x8] sm:$0xff]  ;;  %v184_v32 = vld [vmem:[%s2573_s3 + $0x40] sm:$0xff]  ;;  %p2333_p4 = scmp.ne.s32.totalorder %s3840_s23, %s2332_s6  ;;  %s2412_s7 = smov [#allocation7]  }
  0x5e   : > { %v2609_v19 = vmax.f32 %v247_v14, %v375_v16  ;;  %v245_v21 = vld [vmem:[%s2573_s3 + $0x408] sm:$0xff]  ;;  %v309_v22 = vld [vmem:[%s2573_s3 + $0x18] sm:$0xff]  ;;  %v248_v35 = vld [vmem:[%s2573_s3 + $0x440] sm:$0xff]  ;;  %s2336_s18 = sshll.u32 %s2412_s7, 4  ;;  %s2337_s18 = int_to_ptr.vmem [resolvable:$false] %s2336_s18 }
  0x5f   : > { %v1954_v23 = vpack.i.bf16 %v2600_v13, %v2598_v12  ;;  %v373_v24 = vld [vmem:[%s2573_s3 + $0x418] sm:$0xff]  ;;  %v2617_v25 = vmax.f32 %v181_v20, %v309_v22  ;;  %v185_v26 = vld [vmem:[%s2573_s3 + $0x48] sm:$0xff]  ;;  %1965 = vrot.lane.b32.xlu1 %v1964_v17, %s2411_s15  ;;  %v312_v36 = vld [vmem:[%s2573_s3 + $0x50] sm:$0xff]  ;;  %p2334_p6 = pnand %p2333_p4, %p2521_p12  ;;  %s2338_s24 = scalar_lea.vmem %s2337_s18, 32768 }
  0x60   : > { %v249_v27 = vld [vmem:[%s2573_s3 + $0x448] sm:$0xff]  ;;  %v1969_v28 = vpack.i.bf16 %v2609_v19, %v2607_v18  ;;  %v2624_v29 = vmax.f32 %v245_v21, %v373_v24  ;;  %v313_v30 = vld [vmem:[%s2573_s3 + $0x58] sm:$0xff]  ;;  %v376_v37 = vld [vmem:[%s2573_s3 + $0x450] sm:$0xff]  ;;  %v2639_v39 = vmax.f32 %v184_v32, %v312_v36  ;;  %p2339_p10 = scmp.lt.s32.totalorder %s3840_s23, %s2337_s18  ;;  %p2340_p13 = scmp.lt.s32.totalorder %s2338_s24, %s2332_s6 }
  0x61   : > { %v377_v31 = vld [vmem:[%s2573_s3 + $0x458] sm:$0xff]  ;;  %1955 = vrot.lane.b32.xlu0 %v1954_v23, %s2411_s15  ;;  %v2630_v33 = vmax.f32 %v185_v26, %v313_v30  ;;  %v2641_v40 = vmax.f32 %v248_v35, %v376_v37  ;;  %v187_v41 = vld [vmem:[%s2573_s3 + $0x68] sm:$0xff]  ;;  %v186_v45 = vld [vmem:[%s2573_s3 + $0x60] sm:$0xff]  ;;  %p2335_p8 = pneg %p2334_p6 }
  0x62   : > { %v2632_v34 = vmax.f32 %v249_v27, %v377_v31  ;;  %v1959_v38 = vpack.i.bf16 %v2624_v29, %v2617_v25  ;;  %v251_v42 = vld [vmem:[%s2573_s3 + $0x468] sm:$0xff]  ;;  %v315_v43 = vld [vmem:[%s2573_s3 + $0x78] sm:$0xff]  ;;  %v250_v46 = vld [vmem:[%s2573_s3 + $0x460] sm:$0xff]  ;;  %p2341_p3 = por %p2340_p13, %p2339_p10 }
  0x63   : > { %v379_v44 = vld [vmem:[%s2573_s3 + $0x478] sm:$0xff]  ;;  %1970 = vrot.lane.b32.xlu1 %v1969_v28, %s2411_s15  ;;  %v2652_v48 = vmax.f32 %v187_v41, %v315_v43  ;;  %v314_v50 = vld [vmem:[%s2573_s3 + $0x70] sm:$0xff]  ;;  %v189_v52 = vld [vmem:[%s2573_s3 + $0x88] sm:$0xff]  ;;  %v1974_v53 = vpack.i.bf16 %v2641_v40, %v2639_v39 }
  0x64   : > { %v1979_v47 = vpack.i.bf16 %v2632_v34, %v2630_v33  ;;  %v2654_v49 = vmax.f32 %v251_v42, %v379_v44  ;;  %v378_v51 = vld [vmem:[%s2573_s3 + $0x470] sm:$0xff]  ;;  %v2662_v54 = vmax.f32 %v186_v45, %v314_v50  ;;  %v253_v56 = vld [vmem:[%s2573_s3 + $0x488] sm:$0xff]  ;;  %v317_v57 = vld [vmem:[%s2573_s3 + $0x98] sm:$0xff]  ;;  %p2342_p7 = pnand %p2341_p3, %p2335_p8 }
  0x65   : > { %1960 = vrot.lane.b32.xlu0 %v1959_v38, %s2411_s15  ;;  %v2664_v55 = vmax.f32 %v250_v46, %v378_v51  ;;  %v381_v58 = vld [vmem:[%s2573_s3 + $0x498] sm:$0xff]  ;;  %v188_v59 = vld [vmem:[%s2573_s3 + $0x80] sm:$0xff]  ;;  %v316_v61 = vld [vmem:[%s2573_s3 + $0x90] sm:$0xff]  ;;  %v2676_v1 = vmax.f32 %v189_v52, %v317_v57 }
  0x66   : > { %v252_v60 = vld [vmem:[%s2573_s3 + $0x480] sm:$0xff]  ;;  %v380_v62 = vld [vmem:[%s2573_s3 + $0x490] sm:$0xff]  ;;  %v1989_v63 = vpack.i.bf16 %v2654_v49, %v2652_v48  ;;  %v2678_v2 = vmax.f32 %v253_v56, %v381_v58  ;;  %v191_v3 = vld [vmem:[%s2573_s3 + $0xa8] sm:$0xff]  ;;  %v2685_v7 = vmax.f32 %v188_v59, %v316_v61 }
  0x67   : > { %1980 = vrot.lane.b32.xlu1 %v1979_v47, %s2411_s15  ;;  %v255_v4 = vld [vmem:[%s2573_s3 + $0x4a8] sm:$0xff]  ;;  %v1984_v6 = vpack.i.bf16 %v2664_v55, %v2662_v54  ;;  %v2687_v9 = vmax.f32 %v252_v60, %v380_v62  ;;  %v319_v10 = vld [vmem:[%s2573_s3 + $0xb8] sm:$0xff]  ;;  %v190_v14 = vld [vmem:[%s2573_s3 + $0xa0] sm:$0xff] }
  0x68   : > { %v383_v11 = vld [vmem:[%s2573_s3 + $0x4b8] sm:$0xff]  ;;  %v254_v15 = vld [vmem:[%s2573_s3 + $0x4a0] sm:$0xff]  ;;  %v318_v16 = vld [vmem:[%s2573_s3 + $0xb0] sm:$0xff]  ;;  %v1999_v20 = vpack.i.bf16 %v2678_v2, %v2676_v1  ;;  %v2698_v21 = vmax.f32 %v191_v3, %v319_v10 }
  0x69   : > { %1975 = vrot.lane.b32.xlu0 %v1974_v53, %s2411_s15  ;;  %v382_v17 = vld [vmem:[%s2573_s3 + $0x4b0] sm:$0xff]  ;;  %v2700_v22 = vmax.f32 %v255_v4, %v383_v11  ;;  %v193_v23 = vld [vmem:[%s2573_s3 + $0xc8] sm:$0xff]  ;;  %v1994_v26 = vpack.i.bf16 %v2687_v9, %v2685_v7  ;;  %v2707_v27 = vmax.f32 %v190_v14, %v318_v16  ;;  %v321_v30 = vld [vmem:[%s2573_s3 + $0xd8] sm:$0xff] }
  0x6a   : > { %v257_v24 = vld [vmem:[%s2573_s3 + $0x4c8] sm:$0xff]  ;;  %v2709_v28 = vmax.f32 %v254_v15, %v382_v17  ;;  %v385_v31 = vld [vmem:[%s2573_s3 + $0x4d8] sm:$0xff]  ;;  %v192_v32 = vld [vmem:[%s2573_s3 + $0xc0] sm:$0xff]  ;;  %v2720_v41 = vmax.f32 %v193_v23, %v321_v30 }
  0x6b   : > { %1990 = vrot.lane.b32.xlu1 %v1989_v63, %s2411_s15  ;;  %v256_v35 = vld [vmem:[%s2573_s3 + $0x4c0] sm:$0xff]  ;;  %v320_v36 = vld [vmem:[%s2573_s3 + $0xd0] sm:$0xff]  ;;  %v2009_v38 = vpack.i.bf16 %v2700_v22, %v2698_v21  ;;  %v2722_v42 = vmax.f32 %v257_v24, %v385_v31  ;;  %v195_v43 = vld [vmem:[%s2573_s3 + $0xe8] sm:$0xff] }
  0x6c   : > { %v384_v37 = vld [vmem:[%s2573_s3 + $0x4d0] sm:$0xff]  ;;  %v259_v44 = vld [vmem:[%s2573_s3 + $0x4e8] sm:$0xff]  ;;  %v2004_v45 = vpack.i.bf16 %v2709_v28, %v2707_v27  ;;  %v2729_v46 = vmax.f32 %v192_v32, %v320_v36  ;;  %v323_v50 = vld [vmem:[%s2573_s3 + $0xf8] sm:$0xff] }
  0x6d   : > { %1985 = vrot.lane.b32.xlu0 %v1984_v6, %s2411_s15  ;;  %v2731_v47 = vmax.f32 %v256_v35, %v384_v37  ;;  %v387_v51 = vld [vmem:[%s2573_s3 + $0x4f8] sm:$0xff]  ;;  %v194_v52 = vld [vmem:[%s2573_s3 + $0xe0] sm:$0xff]  ;;  %v322_v56 = vld [vmem:[%s2573_s3 + $0xf0] sm:$0xff]  ;;  %v2019_v58 = vpack.i.bf16 %v2722_v42, %v2720_v41  ;;  %v2742_v59 = vmax.f32 %v195_v43, %v323_v50 }
  0x6e   : > { %v258_v53 = vld [vmem:[%s2573_s3 + $0x4e0] sm:$0xff]  ;;  %v386_v57 = vld [vmem:[%s2573_s3 + $0x4f0] sm:$0xff]  ;;  %v2744_v60 = vmax.f32 %v259_v44, %v387_v51  ;;  %v197_v61 = vld [vmem:[%s2573_s3 + $0x108] sm:$0xff]  ;;  %v2751_v3 = vmax.f32 %v194_v52, %v322_v56 }
  0x6f   : > { %2000 = vrot.lane.b32.xlu1 %v1999_v20, %s2411_s15  ;;  %v261_v62 = vld [vmem:[%s2573_s3 + $0x508] sm:$0xff]  ;;  %v2014_v63 = vpack.i.bf16 %v2731_v47, %v2729_v46  ;;  %v2753_v4 = vmax.f32 %v258_v53, %v386_v57  ;;  %v325_v6 = vld [vmem:[%s2573_s3 + $0x118] sm:$0xff]  ;;  %v196_v11 = vld [vmem:[%s2573_s3 + $0x100] sm:$0xff] }
  0x70   : > { %v389_v10 = vld [vmem:[%s2573_s3 + $0x518] sm:$0xff]  ;;  %v260_v14 = vld [vmem:[%s2573_s3 + $0x500] sm:$0xff]  ;;  %v324_v15 = vld [vmem:[%s2573_s3 + $0x110] sm:$0xff]  ;;  %v2029_v17 = vpack.i.bf16 %v2744_v60, %v2742_v59  ;;  %v2764_v20 = vmax.f32 %v197_v61, %v325_v6 }
  0x71   : > { %1995 = vrot.lane.b32.xlu0 %v1994_v26, %s2411_s15  ;;  %v388_v16 = vld [vmem:[%s2573_s3 + $0x510] sm:$0xff]  ;;  %v2766_v23 = vmax.f32 %v261_v62, %v389_v10  ;;  %v199_v24 = vld [vmem:[%s2573_s3 + $0x128] sm:$0xff]  ;;  %v2024_v30 = vpack.i.bf16 %v2753_v4, %v2751_v3  ;;  %v2773_v31 = vmax.f32 %v196_v11, %v324_v15  ;;  %v327_v35 = vld [vmem:[%s2573_s3 + $0x138] sm:$0xff] }
  0x72   : > { %v263_v26 = vld [vmem:[%s2573_s3 + $0x528] sm:$0xff]  ;;  %v2775_v32 = vmax.f32 %v260_v14, %v388_v16  ;;  %v391_v36 = vld [vmem:[%s2573_s3 + $0x538] sm:$0xff]  ;;  %v198_v37 = vld [vmem:[%s2573_s3 + $0x120] sm:$0xff]  ;;  %v2786_v50 = vmax.f32 %v199_v24, %v327_v35 }
  0x73   : > { %2010 = vrot.lane.b32.xlu1 %v2009_v38, %s2411_s15  ;;  %3996 = vst [vmem:[#allocation11_spill] sm:$0xff] %v2773_v31  ;;  %v262_v38 = vld [vmem:[%s2573_s3 + $0x520] sm:$0xff]  ;;  %v326_v43 = vld [vmem:[%s2573_s3 + $0x130] sm:$0xff]  ;;  %v2788_v51 = vmax.f32 %v263_v26, %v391_v36  ;;  %v201_v52 = vld [vmem:[%s2573_s3 + $0x148] sm:$0xff] }
  0x74   : > { %3997 = vst [vmem:[#allocation12_spill] sm:$0xff] %v2775_v32  ;;  %v390_v44 = vld [vmem:[%s2573_s3 + $0x530] sm:$0xff]  ;;  %3998 = vst [vmem:[#allocation13_spill] sm:$0xff] %v2786_v50  ;;  %v265_v53 = vld [vmem:[%s2573_s3 + $0x548] sm:$0xff]  ;;  %v2034_v56 = vpack.i.bf16 %v2775_v32, %v2773_v31  ;;  %v2795_v57 = vmax.f32 %v198_v37, %v326_v43 }
  0x75   : > { %2005 = vrot.lane.b32.xlu0 %v2004_v45, %s2411_s15  ;;  %v2039_v45 = vpack.i.bf16 %v2766_v23, %v2764_v20  ;;  %3999 = vst [vmem:[#allocation14_spill] sm:$0xff] %v2788_v51  ;;  %v329_v61 = vld [vmem:[%s2573_s3 + $0x158] sm:$0xff]  ;;  %v264_v6 = vld [vmem:[%s2573_s3 + $0x540] sm:$0xff]  ;;  %v328_v10 = vld [vmem:[%s2573_s3 + $0x150] sm:$0xff]  ;;  %v2049_v15 = vpack.i.bf16 %v2788_v51, %v2786_v50 }
  0x76   : > { %4000 = vst [vmem:[#allocation15_spill] sm:$0xff] %v2795_v57  ;;  %v393_v62 = vld [vmem:[%s2573_s3 + $0x558] sm:$0xff]  ;;  %v392_v11 = vld [vmem:[%s2573_s3 + $0x550] sm:$0xff]  ;;  %v203_v14 = vld [vmem:[%s2573_s3 + $0x168] sm:$0xff]  ;;  %v2809_v16 = vmax.f32 %v201_v52, %v329_v61 }
  0x77   : > { %2020 = vrot.lane.b32.xlu1 %v2019_v58, %s2411_s15  ;;  %v2797_v58 = vmax.f32 %v262_v38, %v390_v44  ;;  %v267_v24 = vld [vmem:[%s2573_s3 + $0x568] sm:$0xff]  ;;  %v331_v26 = vld [vmem:[%s2573_s3 + $0x178] sm:$0xff]  ;;  %v2821_v37 = vmax.f32 %v264_v6, %v392_v11  ;;  %v202_v38 = vld [vmem:[%s2573_s3 + $0x160] sm:$0xff] }
  0x78   : > { %4002 = vst [vmem:[#allocation17_spill] sm:$0xff] %v2809_v16  ;;  %v266_v43 = vld [vmem:[%s2573_s3 + $0x560] sm:$0xff]  ;;  %v330_v44 = vld [vmem:[%s2573_s3 + $0x170] sm:$0xff]  ;;  %v2827_v61 = vmax.f32 %v203_v14, %v331_v26  ;;  %v269_v0 = vld [vmem:[%s2573_s3 + $0x588] sm:$0xff] }
  0x79   : > { %2015 = vrot.lane.b32.xlu0 %v2014_v63, %s2411_s15  ;;  %4001 = vst [vmem:[#allocation16_spill] sm:$0xff] %v2797_v58  ;;  %v200_v63 = vld [vmem:[%s2573_s3 + $0x140] sm:$0xff]  ;;  %v2044_v35 = vpack.i.bf16 %v2797_v58, %v2795_v57  ;;  %4005 = vst [vmem:[#allocation20_spill] sm:$0xff] %v2821_v37  ;;  %v332_v51 = vld [vmem:[%s2573_s3 + $0x190] sm:$0xff] }
  0x7a   : > { %v2819_v36 = vmax.f32 %v200_v63, %v328_v10  ;;  %v1079_v52 = vld [vmem:[#allocation5] sm:$0xff]  ;;  %4006 = vst [vmem:[#allocation21_spill] sm:$0xff] %v2827_v61  ;;  %v333_v63 = vld [vmem:[%s2573_s3 + $0x198] sm:$0xff] }
  0x7b   : > { %2030 = vrot.lane.b32.xlu1 %v2029_v17, %s2411_s15  ;;  %v2811_v17 = vmax.f32 %v265_v53, %v393_v62  ;;  %v1080_v53 = vld [vmem:[#allocation5 + $0x8] sm:$0xff]  ;;  %v397_v10 = vld [vmem:[%s2573_s3 + $0x598] sm:$0xff]  ;;  %v204_v58 = vld [vmem:[%s2573_s3 + $0x180] sm:$0xff] }
  0x7c   : > { %4004 = vst [vmem:[#allocation19_spill] sm:$0xff] %v2819_v36  ;;  %v205_v62 = vld [vmem:[%s2573_s3 + $0x188] sm:$0xff]  ;;  %v1810_v6 = vpack.c.bf16 %v1080_v53, %v1079_v52  ;;  %v268_v57 = vld [vmem:[%s2573_s3 + $0x580] sm:$0xff]  ;;  %v2054_v14 = vpack.i.bf16 %v2821_v37, %v2819_v36  ;;  %v1082_v52 = vld [vmem:[#allocation5 + $0x18] sm:$0xff]  ;;  %v4010_v53 = vmov 0.0|0.0  }
  0x7d   : > { %2025 = vrot.lane.b32.xlu0 %v2024_v30, %s2411_s15  ;;  %4003 = vst [vmem:[#allocation18_spill] sm:$0xff] %v2811_v17  ;;  %v395_v30 = vld [vmem:[%s2573_s3 + $0x578] sm:$0xff]  ;;  %v2059_v11 = vpack.i.bf16 %v2811_v17, %v2809_v16  ;;  %v207_v16 = vld [vmem:[%s2573_s3 + $0x1a8] sm:$0xff]  ;;  %v272_v37 = vld [vmem:[%s2573_s3 + $0x5c0] sm:$0xff] }
  0x7e   : > { %1811 = vmatpush1.bf16.msra.mxu0 %v1810_v6  ;;  %1873 = vmatpush1.bf16.msra.mxu1 %v1810_v6  ;;  %v336_v36 = vld [vmem:[%s2573_s3 + $0x1d0] sm:$0xff]  ;;  %v294_v50 = vld [vmem:[%s2573_s3 + $0x720] sm:$0xff] }
  0x7f   : > { %2040 = vrot.lane.b32.xlu1 %v2039_v45, %s2411_s15  ;;  %v394_v45 = vld [vmem:[%s2573_s3 + $0x570] sm:$0xff]  ;;  %1812 = vmatprep.subr.bf16.mxu0 %v4010_v53 }
  0x80   : > { %v2846_v26 = vmax.f32 %v266_v43, %v394_v45  ;;  %1858 = vmatprep.subr.bf16.mxu1 %v4010_v53  ;;  %v2856_v43 = vmax.f32 %v205_v62, %v333_v63  ;;  %v2860_v45 = vmax.f32 %v204_v58, %v332_v51  ;;  %v206_v62 = vld [vmem:[%s2573_s3 + $0x1a0] sm:$0xff]  ;;  %v334_v51 = vld [vmem:[%s2573_s3 + $0x1b0] sm:$0xff] }
  0x81   : > { %2035 = vrot.lane.b32.xlu0 %v2034_v56, %s2411_s15  ;;  %v2829_v56 = vmax.f32 %v267_v24, %v395_v30  ;;  %v2844_v24 = vmax.f32 %v202_v38, %v330_v44  ;;  %v396_v30 = vld [vmem:[%s2573_s3 + $0x590] sm:$0xff]  ;;  %v271_v38 = vld [vmem:[%s2573_s3 + $0x5a8] sm:$0xff]  ;;  %v2858_v44 = vmax.f32 %v269_v0, %v397_v10  ;;  %v270_v63 = vld [vmem:[%s2573_s3 + $0x5a0] sm:$0xff] }
  0x82   : > { %4009 = vst [vmem:[#allocation24_spill] sm:$0xff] %v2846_v26  ;;  %4011 = vst [vmem:[#allocation25_spill] sm:$0xff] %v2856_v43  ;;  %v2862_v6 = vmax.f32 %v268_v57, %v396_v30  ;;  %v1084_v0 = vld [vmem:[#allocation5 + $0x28] sm:$0xff]  ;;  %v398_v57 = vld [vmem:[%s2573_s3 + $0x5b0] sm:$0xff] }
  0x83   : > { %4007 = vst [vmem:[#allocation22_spill] sm:$0xff] %v2829_v56  ;;  %2050 = vrot.lane.b32.xlu1 %v2049_v15, %s2411_s15  ;;  %4008 = vst [vmem:[#allocation23_spill] sm:$0xff] %v2844_v24  ;;  %v1081_v15 = vld [vmem:[#allocation5 + $0x10] sm:$0xff] }
  0x84   : > { %v1813_v17 = vpack.c.bf16 %v1082_v52, %v1081_v15  ;;  %4012 = vst [vmem:[#allocation26_spill] sm:$0xff] %v2858_v44  ;;  %4013 = vst [vmem:[#allocation27_spill] sm:$0xff] %v2860_v45  ;;  %v335_v15 = vld [vmem:[%s2573_s3 + $0x1b8] sm:$0xff] }
  0x85   : > { %2045 = vrot.lane.b32.xlu0 %v2044_v35, %s2411_s15  ;;  %v2069_v35 = vpack.i.bf16 %v2829_v56, %v2827_v61  ;;  %4014 = vst [vmem:[#allocation28_spill] sm:$0xff] %v2862_v6  ;;  %v399_v52 = vld [vmem:[%s2573_s3 + $0x5b8] sm:$0xff]  ;;  %v1083_v56 = vld [vmem:[#allocation5 + $0x20] sm:$0xff]  ;;  %v2874_v10 = vmax.f32 %v207_v16, %v335_v15  ;;  %v2074_v16 = vpack.i.bf16 %v2862_v6, %v2860_v45 }
  0x86   : > { %1814 = vmatpush1.bf16.msra.mxu0 %v1813_v17  ;;  %1874 = vmatpush1.bf16.msra.mxu1 %v1813_v17  ;;  %v1816_v58 = vpack.c.bf16 %v1084_v0, %v1083_v56  ;;  %v2876_v30 = vmax.f32 %v271_v38, %v399_v52  ;;  %v401_v61 = vld [vmem:[%s2573_s3 + $0x5d8] sm:$0xff]  ;;  %v2079_v17 = vpack.i.bf16 %v2858_v44, %v2856_v43  ;;  %v208_v56 = vld [vmem:[%s2573_s3 + $0x1c0] sm:$0xff]  ;;  %v1085_v38 = vld [vmem:[#allocation5 + $0x30] sm:$0xff] }
  0x87   : > { %2060 = vrot.lane.b32.xlu1 %v2059_v11, %s2411_s15  ;;  %v2064_v11 = vpack.i.bf16 %v2846_v26, %v2844_v24  ;;  %1815 = vmatprep.subr.bf16.mxu0 %v4010_v53  ;;  %4015 = vst [vmem:[#allocation29_spill] sm:$0xff] %v2874_v10  ;;  %v273_v26 = vld [vmem:[%s2573_s3 + $0x5c8] sm:$0xff]  ;;  %v337_v24 = vld [vmem:[%s2573_s3 + $0x1d8] sm:$0xff]  ;;  %v2890_v52 = vmax.f32 %v206_v62, %v334_v51  ;;  %v1087_v62 = vld [vmem:[#allocation5 + $0x40] sm:$0xff] }
  0x88   : > { %4016 = vst [vmem:[#allocation30_spill] sm:$0xff] %v2876_v30  ;;  %1859 = vmatprep.subr.bf16.mxu1 %v4010_v53  ;;  %v1086_v15 = vld [vmem:[#allocation5 + $0x38] sm:$0xff]  ;;  %v2892_v0 = vmax.f32 %v270_v63, %v398_v57  ;;  %v2089_v6 = vpack.i.bf16 %v2876_v30, %v2874_v10  ;;  %v1088_v63 = vld [vmem:[#allocation5 + $0x48] sm:$0xff]  ;;  %v2905_v57 = vmax.f32 %v273_v26, %v401_v61  ;;  %v210_v43 = vld [vmem:[%s2573_s3 + $0x1e0] sm:$0xff] }
  0x89   : > { %2055 = vrot.lane.b32.xlu0 %v2054_v14, %s2411_s15  ;;  %v209_v14 = vld [vmem:[%s2573_s3 + $0x1c8] sm:$0xff]  ;;  %4017 = vst [vmem:[#allocation31_spill] sm:$0xff] %v2890_v52  ;;  %v1819_v44 = vpack.c.bf16 %v1086_v15, %v1085_v38  ;;  %v339_v30 = vld [vmem:[%s2573_s3 + $0x1f8] sm:$0xff]  ;;  %v1822_v61 = vpack.c.bf16 %v1088_v63, %v1087_v62 }
  0x8a   : > { %4018 = vst [vmem:[#allocation32_spill] sm:$0xff] %v2892_v0  ;;  %1817 = vmatpush1.bf16.msra.mxu0 %v1816_v58  ;;  %1875 = vmatpush1.bf16.msra.mxu1 %v1816_v58  ;;  %v2903_v51 = vmax.f32 %v209_v14, %v337_v24  ;;  %4020 = vst [vmem:[#allocation34_spill] sm:$0xff] %v2905_v57  ;;  %v2907_v58 = vmax.f32 %v208_v56, %v336_v36  ;;  %v275_v15 = vld [vmem:[%s2573_s3 + $0x5e8] sm:$0xff]  ;;  %v403_v10 = vld [vmem:[%s2573_s3 + $0x5f8] sm:$0xff] }
  0x8b   : > { %2070 = vrot.lane.b32.xlu1 %v2069_v35, %s2411_s15  ;;  %v400_v35 = vld [vmem:[%s2573_s3 + $0x5d0] sm:$0xff]  ;;  %1818 = vmatprep.subr.bf16.mxu0 %v4010_v53  ;;  %v2084_v45 = vpack.i.bf16 %v2892_v0, %v2890_v52  ;;  %v2924_v14 = vmax.f32 %v275_v15, %v403_v10  ;;  %v277_v56 = vld [vmem:[%s2573_s3 + $0x608] sm:$0xff]  ;;  %v341_v63 = vld [vmem:[%s2573_s3 + $0x218] sm:$0xff] }
  0x8c   : > { %1860 = vmatprep.subr.bf16.mxu1 %v4010_v53  ;;  %4019 = vst [vmem:[#allocation33_spill] sm:$0xff] %v2903_v51  ;;  %4021 = vst [vmem:[#allocation35_spill] sm:$0xff] %v2907_v58  ;;  %v2909_v38 = vmax.f32 %v272_v37, %v400_v35  ;;  %v338_v36 = vld [vmem:[%s2573_s3 + $0x1f0] sm:$0xff]  ;;  %v1090_v35 = vld [vmem:[#allocation5 + $0x58] sm:$0xff] }
  0x8d   : > { %2065 = vrot.lane.b32.xlu0 %v2064_v11, %s2411_s15  ;;  %v211_v11 = vld [vmem:[%s2573_s3 + $0x1e8] sm:$0xff]  ;;  %v402_v37 = vld [vmem:[%s2573_s3 + $0x5f0] sm:$0xff]  ;;  %4024 = vst [vmem:[#allocation38_spill] sm:$0xff] %v2924_v14  ;;  %v2938_v10 = vmax.f32 %v210_v43, %v338_v36  ;;  %v276_v0 = vld [vmem:[%s2573_s3 + $0x600] sm:$0xff] }
  0x8e   : > { %4022 = vst [vmem:[#allocation36_spill] sm:$0xff] %v2909_v38  ;;  %1820 = vmatpush1.bf16.msra.mxu0 %v1819_v44  ;;  %1876 = vmatpush1.bf16.msra.mxu1 %v1819_v44  ;;  %v1089_v24 = vld [vmem:[#allocation5 + $0x50] sm:$0xff]  ;;  %v2922_v26 = vmax.f32 %v211_v11, %v339_v30  ;;  %v2099_v44 = vpack.i.bf16 %v2905_v57, %v2903_v51  ;;  %v405_v30 = vld [vmem:[%s2573_s3 + $0x618] sm:$0xff]  ;;  %v212_v11 = vld [vmem:[%s2573_s3 + $0x200] sm:$0xff] }
  0x8f   : > { %2080 = vrot.lane.b32.xlu1 %v2079_v17, %s2411_s15  ;;  %v274_v17 = vld [vmem:[%s2573_s3 + $0x5e0] sm:$0xff]  ;;  %1821 = vmatprep.subr.bf16.mxu0 %v4010_v53  ;;  %v2094_v62 = vpack.i.bf16 %v2909_v38, %v2907_v58  ;;  %4025 = vst [vmem:[#allocation39_spill] sm:$0xff] %v2938_v10  ;;  %v340_v52 = vld [vmem:[%s2573_s3 + $0x210] sm:$0xff]  ;;  %v1825_v57 = vpack.c.bf16 %v1090_v35, %v1089_v24  ;;  %v1092_v58 = vld [vmem:[#allocation5 + $0x68] sm:$0xff] }
  0x90   : > { %4023 = vst [vmem:[#allocation37_spill] sm:$0xff] %v2922_v26  ;;  %1861 = vmatprep.subr.bf16.mxu1 %v4010_v53  ;;  %v2940_v15 = vmax.f32 %v274_v17, %v402_v37  ;;  %v1091_v38 = vld [vmem:[#allocation5 + $0x60] sm:$0xff]  ;;  %v2109_v43 = vpack.i.bf16 %v2924_v14, %v2922_v26  ;;  %v2953_v36 = vmax.f32 %v277_v56, %v405_v30  ;;  %v279_v24 = vld [vmem:[%s2573_s3 + $0x628] sm:$0xff]  ;;  %v343_v35 = vld [vmem:[%s2573_s3 + $0x238] sm:$0xff] }
  0x91   : > { %2075 = vrot.lane.b32.xlu0 %v2074_v16, %s2411_s15  ;;  %v213_v16 = vld [vmem:[%s2573_s3 + $0x208] sm:$0xff]  ;;  %v407_v51 = vld [vmem:[%s2573_s3 + $0x638] sm:$0xff]  ;;  %v214_v26 = vld [vmem:[%s2573_s3 + $0x220] sm:$0xff] }
  0x92   : > { %4026 = vst [vmem:[#allocation40_spill] sm:$0xff] %v2940_v15  ;;  %1823 = vmatpush1.bf16.msra.mxu0 %v1822_v61  ;;  %1877 = vmatpush1.bf16.msra.mxu1 %v1822_v61  ;;  %v2951_v17 = vmax.f32 %v213_v16, %v341_v63  ;;  %4028 = vst [vmem:[#allocation42_spill] sm:$0xff] %v2953_v36  ;;  %v2955_v61 = vmax.f32 %v212_v11, %v340_v52  ;;  %v342_v16 = vld [vmem:[%s2573_s3 + $0x230] sm:$0xff]  ;;  %v1094_v63 = vld [vmem:[#allocation5 + $0x78] sm:$0xff] }
  0x93   : > { %2090 = vrot.lane.b32.xlu1 %v2089_v6, %s2411_s15  ;;  %v404_v6 = vld [vmem:[%s2573_s3 + $0x610] sm:$0xff]  ;;  %1824 = vmatprep.subr.bf16.mxu0 %v4010_v53  ;;  %v2104_v14 = vpack.i.bf16 %v2940_v15, %v2938_v10  ;;  %v1828_v52 = vpack.c.bf16 %v1092_v58, %v1091_v38  ;;  %v2972_v30 = vmax.f32 %v279_v24, %v407_v51  ;;  %v217_v11 = vld [vmem:[%s2573_s3 + $0x248] sm:$0xff]  ;;  %v345_v38 = vld [vmem:[%s2573_s3 + $0x258] sm:$0xff] }
  0x94   : > { %1862 = vmatprep.subr.bf16.mxu1 %v4010_v53  ;;  %4027 = vst [vmem:[#allocation41_spill] sm:$0xff] %v2951_v17  ;;  %4029 = vst [vmem:[#allocation43_spill] sm:$0xff] %v2955_v61  ;;  %v2957_v37 = vmax.f32 %v276_v0, %v404_v6  ;;  %v406_v0 = vld [vmem:[%s2573_s3 + $0x630] sm:$0xff]  ;;  %v281_v6 = vld [vmem:[%s2573_s3 + $0x648] sm:$0xff]  ;;  %v2986_v51 = vmax.f32 %v214_v26, %v342_v16 }
  0x95   : > { %2085 = vrot.lane.b32.xlu0 %v2084_v45, %s2411_s15  ;;  %v215_v45 = vld [vmem:[%s2573_s3 + $0x228] sm:$0xff]  ;;  %v1093_v56 = vld [vmem:[#allocation5 + $0x70] sm:$0xff]  ;;  %4032 = vst [vmem:[#allocation46_spill] sm:$0xff] %v2972_v30  ;;  %v409_v15 = vld [vmem:[%s2573_s3 + $0x658] sm:$0xff] }
  0x96   : > { %4030 = vst [vmem:[#allocation44_spill] sm:$0xff] %v2957_v37  ;;  %1826 = vmatpush1.bf16.msra.mxu0 %v1825_v57  ;;  %1878 = vmatpush1.bf16.msra.mxu1 %v1825_v57  ;;  %v2119_v57 = vpack.i.bf16 %v2953_v36, %v2951_v17  ;;  %v2114_v58 = vpack.i.bf16 %v2957_v37, %v2955_v61  ;;  %4033 = vst [vmem:[#allocation47_spill] sm:$0xff] %v2986_v51  ;;  %v344_v10 = vld [vmem:[%s2573_s3 + $0x250] sm:$0xff]  ;;  %v1095_v37 = vld [vmem:[#allocation5 + $0x80] sm:$0xff] }
  0x97   : > { %2100 = vrot.lane.b32.xlu1 %v2099_v44, %s2411_s15  ;;  %v278_v44 = vld [vmem:[%s2573_s3 + $0x620] sm:$0xff]  ;;  %1827 = vmatprep.subr.bf16.mxu0 %v4010_v53  ;;  %v1831_v36 = vpack.c.bf16 %v1094_v63, %v1093_v56  ;;  %v1096_v61 = vld [vmem:[#allocation5 + $0x88] sm:$0xff]  ;;  %v3001_v16 = vmax.f32 %v281_v6, %v409_v15  ;;  %v347_v63 = vld [vmem:[%s2573_s3 + $0x278] sm:$0xff] }
  0x98   : > { %1863 = vmatprep.subr.bf16.mxu1 %v4010_v53  ;;  %v2988_v24 = vmax.f32 %v278_v44, %v406_v0  ;;  %v2999_v44 = vmax.f32 %v217_v11, %v345_v38  ;;  %v283_v56 = vld [vmem:[%s2573_s3 + $0x668] sm:$0xff]  ;;  %v411_v17 = vld [vmem:[%s2573_s3 + $0x678] sm:$0xff]  ;;  %v346_v11 = vld [vmem:[%s2573_s3 + $0x270] sm:$0xff] }
  0x99   : > { %2095 = vrot.lane.b32.xlu0 %v2094_v62, %s2411_s15  ;;  %v2970_v62 = vmax.f32 %v215_v45, %v343_v35  ;;  %v216_v45 = vld [vmem:[%s2573_s3 + $0x240] sm:$0xff]  ;;  %4036 = vst [vmem:[#allocation50_spill] sm:$0xff] %v3001_v16  ;;  %v410_v15 = vld [vmem:[%s2573_s3 + $0x670] sm:$0xff]  ;;  %v1098_v38 = vld [vmem:[#allocation5 + $0x98] sm:$0xff] }
  0x9a   : > { %4034 = vst [vmem:[#allocation48_spill] sm:$0xff] %v2988_v24  ;;  %v280_v35 = vld [vmem:[%s2573_s3 + $0x640] sm:$0xff]  ;;  %1829 = vmatpush1.bf16.msra.mxu0 %v1828_v52  ;;  %1879 = vmatpush1.bf16.msra.mxu1 %v1828_v52  ;;  %4035 = vst [vmem:[#allocation49_spill] sm:$0xff] %v2999_v44  ;;  %v3003_v52 = vmax.f32 %v216_v45, %v344_v10  ;;  %v1834_v10 = vpack.c.bf16 %v1096_v61, %v1095_v37  ;;  %v1097_v6 = vld [vmem:[#allocation5 + $0x90] sm:$0xff] }
  0x9b   : > { %4031 = vst [vmem:[#allocation45_spill] sm:$0xff] %v2970_v62  ;;  %2110 = vrot.lane.b32.xlu1 %v2109_v43, %s2411_s15  ;;  %v408_v43 = vld [vmem:[%s2573_s3 + $0x650] sm:$0xff]  ;;  %1830 = vmatprep.subr.bf16.mxu0 %v4010_v53  ;;  %v2129_v26 = vpack.i.bf16 %v2972_v30, %v2970_v62  ;;  %v2124_v30 = vpack.i.bf16 %v2988_v24, %v2986_v51  ;;  %v218_v62 = vld [vmem:[%s2573_s3 + $0x260] sm:$0xff]  ;;  %v349_v37 = vld [vmem:[%s2573_s3 + $0x298] sm:$0xff] }
  0x9c   : > { %1864 = vmatprep.subr.bf16.mxu1 %v4010_v53  ;;  %4037 = vst [vmem:[#allocation51_spill] sm:$0xff] %v3003_v52  ;;  %v3005_v0 = vmax.f32 %v280_v35, %v408_v43  ;;  %v3020_v45 = vmax.f32 %v283_v56, %v411_v17  ;;  %v221_v35 = vld [vmem:[%s2573_s3 + $0x288] sm:$0xff]  ;;  %v413_v24 = vld [vmem:[%s2573_s3 + $0x698] sm:$0xff]  ;;  %v3034_v17 = vmax.f32 %v218_v62, %v346_v11  ;;  %v348_v51 = vld [vmem:[%s2573_s3 + $0x290] sm:$0xff] }
  0x9d   : > { %2105 = vrot.lane.b32.xlu0 %v2104_v14, %s2411_s15  ;;  %v219_v14 = vld [vmem:[%s2573_s3 + $0x268] sm:$0xff] }
  0x9e   : > { %4038 = vst [vmem:[#allocation52_spill] sm:$0xff] %v3005_v0  ;;  %1832 = vmatpush1.bf16.msra.mxu0 %v1831_v36  ;;  %1880 = vmatpush1.bf16.msra.mxu1 %v1831_v36  ;;  %4040 = vst [vmem:[#allocation54_spill] sm:$0xff] %v3020_v45  ;;  %v285_v43 = vld [vmem:[%s2573_s3 + $0x688] sm:$0xff]  ;;  %v2139_v36 = vpack.i.bf16 %v3001_v16, %v2999_v44  ;;  %v2134_v61 = vpack.i.bf16 %v3005_v0, %v3003_v52  ;;  %v1099_v0 = vld [vmem:[#allocation5 + $0xa0] sm:$0xff] }
  0x9f   : > { %2120 = vrot.lane.b32.xlu1 %v2119_v57, %s2411_s15  ;;  %v282_v57 = vld [vmem:[%s2573_s3 + $0x660] sm:$0xff]  ;;  %1833 = vmatprep.subr.bf16.mxu0 %v4010_v53  ;;  %4041 = vst [vmem:[#allocation55_spill] sm:$0xff] %v3034_v17  ;;  %v1837_v16 = vpack.c.bf16 %v1098_v38, %v1097_v6  ;;  %v1100_v52 = vld [vmem:[#allocation5 + $0xa8] sm:$0xff]  ;;  %v3049_v11 = vmax.f32 %v285_v43, %v413_v24  ;;  %v351_v38 = vld [vmem:[%s2573_s3 + $0x2b8] sm:$0xff] }
  0xa0   : > { %1865 = vmatprep.subr.bf16.mxu1 %v4010_v53  ;;  %v3036_v56 = vmax.f32 %v282_v57, %v410_v15  ;;  %v3047_v57 = vmax.f32 %v221_v35, %v349_v37  ;;  %v287_v6 = vld [vmem:[%s2573_s3 + $0x6a8] sm:$0xff]  ;;  %v415_v44 = vld [vmem:[%s2573_s3 + $0x6b8] sm:$0xff]  ;;  %v350_v35 = vld [vmem:[%s2573_s3 + $0x2b0] sm:$0xff] }
  0xa1   : > { %2115 = vrot.lane.b32.xlu0 %v2114_v58, %s2411_s15  ;;  %v3018_v58 = vmax.f32 %v219_v14, %v347_v63  ;;  %v220_v14 = vld [vmem:[%s2573_s3 + $0x280] sm:$0xff]  ;;  %4044 = vst [vmem:[#allocation58_spill] sm:$0xff] %v3049_v11  ;;  %v414_v24 = vld [vmem:[%s2573_s3 + $0x6b0] sm:$0xff]  ;;  %v1102_v37 = vld [vmem:[#allocation5 + $0xb8] sm:$0xff] }
  0xa2   : > { %4042 = vst [vmem:[#allocation56_spill] sm:$0xff] %v3036_v56  ;;  %v284_v63 = vld [vmem:[%s2573_s3 + $0x680] sm:$0xff]  ;;  %1835 = vmatpush1.bf16.msra.mxu0 %v1834_v10  ;;  %1881 = vmatpush1.bf16.msra.mxu1 %v1834_v10  ;;  %4043 = vst [vmem:[#allocation57_spill] sm:$0xff] %v3047_v57  ;;  %v3051_v10 = vmax.f32 %v220_v14, %v348_v51  ;;  %v1840_v51 = vpack.c.bf16 %v1100_v52, %v1099_v0  ;;  %v1101_v43 = vld [vmem:[#allocation5 + $0xb0] sm:$0xff] }
  0xa3   : > { %4039 = vst [vmem:[#allocation53_spill] sm:$0xff] %v3018_v58  ;;  %2130 = vrot.lane.b32.xlu1 %v2129_v26, %s2411_s15  ;;  %v412_v26 = vld [vmem:[%s2573_s3 + $0x690] sm:$0xff]  ;;  %1836 = vmatprep.subr.bf16.mxu0 %v4010_v53  ;;  %v2149_v62 = vpack.i.bf16 %v3020_v45, %v3018_v58  ;;  %v2144_v45 = vpack.i.bf16 %v3036_v56, %v3034_v17  ;;  %v222_v58 = vld [vmem:[%s2573_s3 + $0x2a0] sm:$0xff]  ;;  %v353_v0 = vld [vmem:[%s2573_s3 + $0x2d8] sm:$0xff] }
  0xa4   : > { %1866 = vmatprep.subr.bf16.mxu1 %v4010_v53  ;;  %4045 = vst [vmem:[#allocation59_spill] sm:$0xff] %v3051_v10  ;;  %v3053_v15 = vmax.f32 %v284_v63, %v412_v26  ;;  %v3068_v14 = vmax.f32 %v287_v6, %v415_v44  ;;  %v225_v63 = vld [vmem:[%s2573_s3 + $0x2c8] sm:$0xff]  ;;  %v417_v56 = vld [vmem:[%s2573_s3 + $0x6d8] sm:$0xff]  ;;  %v3082_v44 = vmax.f32 %v222_v58, %v350_v35  ;;  %v352_v17 = vld [vmem:[%s2573_s3 + $0x2d0] sm:$0xff] }
  0xa5   : > { %2125 = vrot.lane.b32.xlu0 %v2124_v30, %s2411_s15  ;;  %v223_v30 = vld [vmem:[%s2573_s3 + $0x2a8] sm:$0xff] }
  0xa6   : > { %4046 = vst [vmem:[#allocation60_spill] sm:$0xff] %v3053_v15  ;;  %1838 = vmatpush1.bf16.msra.mxu0 %v1837_v16  ;;  %1882 = vmatpush1.bf16.msra.mxu1 %v1837_v16  ;;  %4048 = vst [vmem:[#allocation62_spill] sm:$0xff] %v3068_v14  ;;  %v289_v26 = vld [vmem:[%s2573_s3 + $0x6c8] sm:$0xff]  ;;  %v2159_v16 = vpack.i.bf16 %v3049_v11, %v3047_v57  ;;  %v2154_v52 = vpack.i.bf16 %v3053_v15, %v3051_v10  ;;  %v1103_v15 = vld [vmem:[#allocation5 + $0xc0] sm:$0xff] }
  0xa7   : > { %2140 = vrot.lane.b32.xlu1 %v2139_v36, %s2411_s15  ;;  %v286_v36 = vld [vmem:[%s2573_s3 + $0x6a0] sm:$0xff]  ;;  %1839 = vmatprep.subr.bf16.mxu0 %v4010_v53  ;;  %4049 = vst [vmem:[#allocation63_spill] sm:$0xff] %v3082_v44  ;;  %v1843_v11 = vpack.c.bf16 %v1102_v37, %v1101_v43  ;;  %v1104_v10 = vld [vmem:[#allocation5 + $0xc8] sm:$0xff]  ;;  %v3097_v35 = vmax.f32 %v289_v26, %v417_v56  ;;  %v355_v37 = vld [vmem:[%s2573_s3 + $0x2f8] sm:$0xff] }
  0xa8   : > { %1867 = vmatprep.subr.bf16.mxu1 %v4010_v53  ;;  %v3084_v6 = vmax.f32 %v286_v36, %v414_v24  ;;  %v3095_v36 = vmax.f32 %v225_v63, %v353_v0  ;;  %v291_v43 = vld [vmem:[%s2573_s3 + $0x6e8] sm:$0xff]  ;;  %v419_v57 = vld [vmem:[%s2573_s3 + $0x6f8] sm:$0xff]  ;;  %v354_v63 = vld [vmem:[%s2573_s3 + $0x2f0] sm:$0xff] }
  0xa9   : > { %2135 = vrot.lane.b32.xlu0 %v2134_v61, %s2411_s15  ;;  %v3066_v61 = vmax.f32 %v223_v30, %v351_v38  ;;  %v224_v30 = vld [vmem:[%s2573_s3 + $0x2c0] sm:$0xff]  ;;  %4052 = vst [vmem:[#allocation66_spill] sm:$0xff] %v3097_v35  ;;  %v418_v56 = vld [vmem:[%s2573_s3 + $0x6f0] sm:$0xff]  ;;  %v1106_v0 = vld [vmem:[#allocation5 + $0xd8] sm:$0xff] }
  0xaa   : > { %4050 = vst [vmem:[#allocation64_spill] sm:$0xff] %v3084_v6  ;;  %v288_v38 = vld [vmem:[%s2573_s3 + $0x6c0] sm:$0xff]  ;;  %1841 = vmatpush1.bf16.msra.mxu0 %v1840_v51  ;;  %1883 = vmatpush1.bf16.msra.mxu1 %v1840_v51  ;;  %4051 = vst [vmem:[#allocation65_spill] sm:$0xff] %v3095_v36  ;;  %v3099_v51 = vmax.f32 %v224_v30, %v352_v17  ;;  %v1846_v17 = vpack.c.bf16 %v1104_v10, %v1103_v15  ;;  %v1105_v26 = vld [vmem:[#allocation5 + $0xd0] sm:$0xff] }
  0xab   : > { %4047 = vst [vmem:[#allocation61_spill] sm:$0xff] %v3066_v61  ;;  %2150 = vrot.lane.b32.xlu1 %v2149_v62, %s2411_s15  ;;  %v416_v62 = vld [vmem:[%s2573_s3 + $0x6d0] sm:$0xff]  ;;  %1842 = vmatprep.subr.bf16.mxu0 %v4010_v53  ;;  %v2169_v58 = vpack.i.bf16 %v3068_v14, %v3066_v61  ;;  %v2164_v14 = vpack.i.bf16 %v3084_v6, %v3082_v44  ;;  %v226_v61 = vld [vmem:[%s2573_s3 + $0x2e0] sm:$0xff]  ;;  %v357_v15 = vld [vmem:[%s2573_s3 + $0x318] sm:$0xff] }
  0xac   : > { %1868 = vmatprep.subr.bf16.mxu1 %v4010_v53  ;;  %4053 = vst [vmem:[#allocation67_spill] sm:$0xff] %v3099_v51  ;;  %v3101_v24 = vmax.f32 %v288_v38, %v416_v62  ;;  %v3116_v30 = vmax.f32 %v291_v43, %v419_v57  ;;  %v229_v38 = vld [vmem:[%s2573_s3 + $0x308] sm:$0xff]  ;;  %v421_v6 = vld [vmem:[%s2573_s3 + $0x718] sm:$0xff]  ;;  %v3130_v57 = vmax.f32 %v226_v61, %v354_v63  ;;  %v356_v44 = vld [vmem:[%s2573_s3 + $0x310] sm:$0xff] }
  0xad   : > { %2145 = vrot.lane.b32.xlu0 %v2144_v45, %s2411_s15  ;;  %v227_v45 = vld [vmem:[%s2573_s3 + $0x2e8] sm:$0xff] }
  0xae   : > { %4054 = vst [vmem:[#allocation68_spill] sm:$0xff] %v3101_v24  ;;  %1844 = vmatpush1.bf16.msra.mxu0 %v1843_v11  ;;  %1884 = vmatpush1.bf16.msra.mxu1 %v1843_v11  ;;  %4056 = vst [vmem:[#allocation70_spill] sm:$0xff] %v3116_v30  ;;  %v293_v62 = vld [vmem:[%s2573_s3 + $0x708] sm:$0xff]  ;;  %v2179_v11 = vpack.i.bf16 %v3097_v35, %v3095_v36  ;;  %v2174_v10 = vpack.i.bf16 %v3101_v24, %v3099_v51  ;;  %v1107_v24 = vld [vmem:[#allocation5 + $0xe0] sm:$0xff] }
  0xaf   : > { %2160 = vrot.lane.b32.xlu1 %v2159_v16, %s2411_s15  ;;  %v290_v16 = vld [vmem:[%s2573_s3 + $0x6e0] sm:$0xff]  ;;  %1845 = vmatprep.subr.bf16.mxu0 %v4010_v53  ;;  %4057 = vst [vmem:[#allocation71_spill] sm:$0xff] %v3130_v57  ;;  %v1849_v35 = vpack.c.bf16 %v1106_v0, %v1105_v26  ;;  %v1108_v51 = vld [vmem:[#allocation5 + $0xe8] sm:$0xff]  ;;  %v3145_v63 = vmax.f32 %v293_v62, %v421_v6  ;;  %v359_v0 = vld [vmem:[%s2573_s3 + $0x338] sm:$0xff] }
  0xb0   : > { %1869 = vmatprep.subr.bf16.mxu1 %v4010_v53  ;;  %v3132_v43 = vmax.f32 %v290_v16, %v418_v56  ;;  %v3143_v16 = vmax.f32 %v229_v38, %v357_v15  ;;  %v295_v26 = vld [vmem:[%s2573_s3 + $0x728] sm:$0xff]  ;;  %v423_v36 = vld [vmem:[%s2573_s3 + $0x738] sm:$0xff]  ;;  %v358_v38 = vld [vmem:[%s2573_s3 + $0x330] sm:$0xff]  ;;  %v1852_v6 = vpack.c.bf16 %v1108_v51, %v1107_v24 }
  0xb1   : > { %2155 = vrot.lane.b32.xlu0 %v2154_v52, %s2411_s15  ;;  %v3114_v52 = vmax.f32 %v227_v45, %v355_v37  ;;  %v228_v45 = vld [vmem:[%s2573_s3 + $0x300] sm:$0xff]  ;;  %4060 = vst [vmem:[#allocation74_spill] sm:$0xff] %v3145_v63  ;;  %v422_v62 = vld [vmem:[%s2573_s3 + $0x730] sm:$0xff]  ;;  %v3170_v24 = vmax.f32 %v295_v26, %v423_v36  ;;  %v233_v15 = vld [vmem:[%s2573_s3 + $0x348] sm:$0xff] }
  0xb2   : > { %4058 = vst [vmem:[#allocation72_spill] sm:$0xff] %v3132_v43  ;;  %v292_v37 = vld [vmem:[%s2573_s3 + $0x700] sm:$0xff]  ;;  %1847 = vmatpush1.bf16.msra.mxu0 %v1846_v17  ;;  %1885 = vmatpush1.bf16.msra.mxu1 %v1846_v17  ;;  %4059 = vst [vmem:[#allocation73_spill] sm:$0xff] %v3143_v16  ;;  %v3147_v17 = vmax.f32 %v228_v45, %v356_v44  ;;  %v1109_v44 = vld [vmem:[#allocation5 + $0xf0] sm:$0xff] }
  0xb3   : > { %4055 = vst [vmem:[#allocation69_spill] sm:$0xff] %v3114_v52  ;;  %2170 = vrot.lane.b32.xlu1 %v2169_v58, %s2411_s15  ;;  %v420_v58 = vld [vmem:[%s2573_s3 + $0x710] sm:$0xff]  ;;  %1848 = vmatprep.subr.bf16.mxu0 %v4010_v53  ;;  %v2189_v61 = vpack.i.bf16 %v3116_v30, %v3114_v52  ;;  %v2184_v30 = vpack.i.bf16 %v3132_v43, %v3130_v57  ;;  %v230_v52 = vld [vmem:[%s2573_s3 + $0x320] sm:$0xff]  ;;  %4064 = vst [vmem:[#allocation78_spill] sm:$0xff] %v3170_v24 }
  0xb4   : > { %1870 = vmatprep.subr.bf16.mxu1 %v4010_v53  ;;  %4061 = vst [vmem:[#allocation75_spill] sm:$0xff] %v3147_v17  ;;  %v3149_v56 = vmax.f32 %v292_v37, %v420_v58  ;;  %v297_v45 = vld [vmem:[%s2573_s3 + $0x748] sm:$0xff]  ;;  %v3175_v37 = vmax.f32 %v230_v52, %v358_v38  ;;  %v3177_v58 = vmax.f32 %v294_v50, %v422_v62  ;;  %v424_v36 = vld [vmem:[%s2573_s3 + $0x750] sm:$0xff]  ;;  %v363_v62 = vld [vmem:[%s2573_s3 + $0x378] sm:$0xff] }
  0xb5   : > { %2165 = vrot.lane.b32.xlu0 %v2164_v14, %s2411_s15  ;;  %v231_v14 = vld [vmem:[%s2573_s3 + $0x328] sm:$0xff] }
  0xb6   : > { %4062 = vst [vmem:[#allocation76_spill] sm:$0xff] %v3149_v56  ;;  %1850 = vmatpush1.bf16.msra.mxu0 %v1849_v35  ;;  %1886 = vmatpush1.bf16.msra.mxu1 %v1849_v35  ;;  %v2194_v51 = vpack.i.bf16 %v3149_v56, %v3147_v17  ;;  %v3168_v35 = vmax.f32 %v231_v14, %v359_v0  ;;  %4065 = vst [vmem:[#allocation79_spill] sm:$0xff] %v3175_v37  ;;  %v296_v56 = vld [vmem:[%s2573_s3 + $0x740] sm:$0xff]  ;;  %v360_v14 = vld [vmem:[%s2573_s3 + $0x350] sm:$0xff] }
  0xb7   : > { %2180 = vrot.lane.b32.xlu1 %v2179_v11, %s2411_s15  ;;  %1851 = vmatprep.subr.bf16.mxu0 %v4010_v53  ;;  %v1110_v11 = vld [vmem:[#allocation5 + $0xf8] sm:$0xff]  ;;  %4066 = vst [vmem:[#allocation80_spill] sm:$0xff] %v3177_v58  ;;  %v235_v26 = vld [vmem:[%s2573_s3 + $0x368] sm:$0xff]  ;;  %v2204_v38 = vpack.i.bf16 %v3177_v58, %v3175_v37 }
  0xb8   : > { %1871 = vmatprep.subr.bf16.mxu1 %v4010_v53  ;;  %4063 = vst [vmem:[#allocation77_spill] sm:$0xff] %v3168_v35  ;;  %v1855_v43 = vpack.c.bf16 %v1110_v11, %v1109_v44  ;;  %v2209_v50 = vpack.i.bf16 %v3170_v24, %v3168_v35  ;;  %v299_v0 = vld [vmem:[%s2573_s3 + $0x768] sm:$0xff]  ;;  %v427_v44 = vld [vmem:[%s2573_s3 + $0x778] sm:$0xff]  ;;  %v234_v11 = vld [vmem:[%s2573_s3 + $0x360] sm:$0xff] }
  0xb9   : > { %2175 = vrot.lane.b32.xlu0 %v2174_v10, %s2411_s15  ;;  %v2199_v10 = vpack.i.bf16 %v3145_v63, %v3143_v16  ;;  %v425_v63 = vld [vmem:[%s2573_s3 + $0x758] sm:$0xff]  ;;  %v232_v16 = vld [vmem:[%s2573_s3 + $0x340] sm:$0xff]  ;;  %v243_v58 = vld [vmem:[%s2573_s3 + $0x3e8] sm:$0xff] }
  0xba   : > { %1853 = vmatpush1.bf16.msra.mxu0 %v1852_v6  ;;  %1887 = vmatpush1.bf16.msra.mxu1 %v1852_v6  ;;  %v3201_v6 = vmax.f32 %v296_v56, %v424_v36  ;;  %v3212_v56 = vmax.f32 %v235_v26, %v363_v62  ;;  %v236_v26 = vld [vmem:[%s2573_s3 + $0x380] sm:$0xff]  ;;  %v364_v62 = vld [vmem:[%s2573_s3 + $0x390] sm:$0xff]  ;;  %v307_v37 = vld [vmem:[%s2573_s3 + $0x7e8] sm:$0xff] }
  0xbb   : > { %2190 = vrot.lane.b32.xlu1 %v2189_v61, %s2411_s15  ;;  %v361_v61 = vld [vmem:[%s2573_s3 + $0x358] sm:$0xff]  ;;  %1854 = vmatprep.subr.bf16.mxu0 %v4010_v53 }
  0xbc   : > { %1872 = vmatprep.subr.bf16.mxu1 %v4010_v53  ;;  %v3190_v52 = vmax.f32 %v233_v15, %v361_v61  ;;  %v3199_v53 = vmax.f32 %v232_v16, %v360_v14  ;;  %4070 = vst [vmem:[#allocation84_spill] sm:$0xff] %v3201_v6  ;;  %4071 = vst [vmem:[#allocation85_spill] sm:$0xff] %v3212_v56  ;;  %v3214_v15 = vmax.f32 %v299_v0, %v427_v44  ;;  %v301_v61 = vld [vmem:[%s2573_s3 + $0x788] sm:$0xff]  ;;  %v300_v0 = vld [vmem:[%s2573_s3 + $0x780] sm:$0xff] }
  0xbd   : > { %2185 = vrot.lane.b32.xlu0 %v2184_v30, %s2411_s15  ;;  %v3192_v30 = vmax.f32 %v297_v45, %v425_v63  ;;  %v298_v63 = vld [vmem:[%s2573_s3 + $0x760] sm:$0xff]  ;;  %v237_v45 = vld [vmem:[%s2573_s3 + $0x388] sm:$0xff]  ;;  %v428_v44 = vld [vmem:[%s2573_s3 + $0x790] sm:$0xff] }
  0xbe   : > { %4067 = vst [vmem:[#allocation81_spill] sm:$0xff] %v3190_v52  ;;  %4069 = vst [vmem:[#allocation83_spill] sm:$0xff] %v3199_v53  ;;  %1856 = vmatpush1.bf16.msra.mxu0 %v1855_v43  ;;  %1888 = vmatpush1.bf16.msra.mxu1 %v1855_v43  ;;  %v2214_v14 = vpack.i.bf16 %v3201_v6, %v3199_v53  ;;  %v3243_v53 = vmax.f32 %v236_v26, %v364_v62  ;;  %v371_v24 = vld [vmem:[%s2573_s3 + $0x3f8] sm:$0xff] }
  0xbf   : > { %2200 = vrot.lane.b32.xlu1 %v2199_v10, %s2411_s15  ;;  %4068 = vst [vmem:[#allocation82_spill] sm:$0xff] %v3192_v30  ;;  %v362_v10 = vld [vmem:[%s2573_s3 + $0x370] sm:$0xff]  ;;  %v2219_v16 = vpack.i.bf16 %v3192_v30, %v3190_v52  ;;  %4072 = vst [vmem:[#allocation86_spill] sm:$0xff] %v3214_v15  ;;  %v429_v30 = vld [vmem:[%s2573_s3 + $0x798] sm:$0xff] }
  0xc0   : > { %v3221_v43 = vmax.f32 %v234_v11, %v362_v10  ;;  %v239_v10 = vld [vmem:[%s2573_s3 + $0x3a8] sm:$0xff]  ;;  %4077 = vst [vmem:[#allocation91_spill] sm:$0xff] %v3243_v53  ;;  %v367_v52 = vld [vmem:[%s2573_s3 + $0x3b8] sm:$0xff] }
  0xc1   : > { %2195 = vrot.lane.b32.xlu0 %v2194_v51, %s2411_s15  ;;  %v426_v51 = vld [vmem:[%s2573_s3 + $0x770] sm:$0xff]  ;;  %v435_v35 = vld [vmem:[%s2573_s3 + $0x7f8] sm:$0xff] }
  0xc2   : > { %4073 = vst [vmem:[#allocation87_spill] sm:$0xff] %v3221_v43  ;;  %v3223_v36 = vmax.f32 %v298_v63, %v426_v51  ;;  %v3236_v63 = vmax.f32 %v301_v61, %v429_v30  ;;  %v303_v51 = vld [vmem:[%s2573_s3 + $0x7a8] sm:$0xff]  ;;  %v302_v30 = vld [vmem:[%s2573_s3 + $0x7a0] sm:$0xff]  ;;  %v366_v61 = vld [vmem:[%s2573_s3 + $0x3b0] sm:$0xff] }
  0xc3   : > { %2210 = vrot.lane.b32.xlu1 %v2209_v50, %s2411_s15  ;;  %v365_v50 = vld [vmem:[%s2573_s3 + $0x398] sm:$0xff] }
  0xc4   : > { %4074 = vst [vmem:[#allocation88_spill] sm:$0xff] %v3223_v36  ;;  %v3234_v11 = vmax.f32 %v237_v45, %v365_v50  ;;  %4076 = vst [vmem:[#allocation90_spill] sm:$0xff] %v3236_v63  ;;  %v2224_v6 = vpack.i.bf16 %v3223_v36, %v3221_v43  ;;  %v238_v45 = vld [vmem:[%s2573_s3 + $0x3a0] sm:$0xff]  ;;  %v430_v50 = vld [vmem:[%s2573_s3 + $0x7b0] sm:$0xff] }
  0xc5   : > { %2205 = vrot.lane.b32.xlu0 %v2204_v38, %s2411_s15  ;;  %v2229_v38 = vpack.i.bf16 %v3214_v15, %v3212_v56  ;;  %v431_v15 = vld [vmem:[%s2573_s3 + $0x7b8] sm:$0xff]  ;;  %v3267_v56 = vmax.f32 %v238_v45, %v366_v61 }
  0xc6   : > { %4075 = vst [vmem:[#allocation89_spill] sm:$0xff] %v3234_v11  ;;  %v2239_v26 = vpack.i.bf16 %v3236_v63, %v3234_v11  ;;  %v3259_v62 = vmax.f32 %v303_v51, %v431_v15  ;;  %v369_v36 = vld [vmem:[%s2573_s3 + $0x3d8] sm:$0xff]  ;;  %v3269_v63 = vmax.f32 %v302_v30, %v430_v50  ;;  %v304_v15 = vld [vmem:[%s2573_s3 + $0x7c0] sm:$0xff]  ;;  %v432_v51 = vld [vmem:[%s2573_s3 + $0x7d0] sm:$0xff]  ;;  %v820_v11 = vlaneseq }
  0xc7   : > { %2220 = vrot.lane.b32.xlu1 %v2219_v16, %s2411_s15  ;;  %v3245_v16 = vmax.f32 %v300_v0, %v428_v44  ;;  %v3257_v0 = vmax.f32 %v239_v10, %v367_v52  ;;  %v305_v44 = vld [vmem:[%s2573_s3 + $0x7c8] sm:$0xff]  ;;  %v433_v43 = vld [vmem:[%s2573_s3 + $0x7d8] sm:$0xff]  ;;  %v240_v52 = vld [vmem:[%s2573_s3 + $0x3c0] sm:$0xff]  ;;  %v3295_v32 = vmax.f32 %v304_v15, %v432_v51 }
  0xc8   : > { %4079 = vst [vmem:[#allocation93_spill] sm:$0xff] %v3259_v62  ;;  %v368_v10 = vld [vmem:[%s2573_s3 + $0x3d0] sm:$0xff]  ;;  %v3285_v30 = vmax.f32 %v305_v44, %v433_v43  ;;  %v306_v50 = vld [vmem:[%s2573_s3 + $0x7e0] sm:$0xff]  ;;  %v2244_v17 = vpack.i.bf16 %v3269_v63, %v3267_v56  ;;  %v3297_v31 = vand.u32 127, %v820_v11  ;;  %v3301_v43 = vmax.f32 %v307_v37, %v435_v35 }
  0xc9   : > { %2215 = vrot.lane.b32.xlu0 %v2214_v14, %s2411_s15  ;;  %4078 = vst [vmem:[#allocation92_spill] sm:$0xff] %v3245_v16  ;;  %v241_v14 = vld [vmem:[%s2573_s3 + $0x3c8] sm:$0xff]  ;;  %v2249_v45 = vpack.i.bf16 %v3259_v62, %v3257_v0  ;;  %v3293_v57 = vmax.f32 %v240_v52, %v368_v10  ;;  %4081 = vst [vmem:[#allocation95_spill] sm:$0xff] %v3295_v32 }
  0xca   : > { %v3283_v61 = vmax.f32 %v241_v14, %v369_v36  ;;  %v3299_v36 = vmax.f32 %v243_v58, %v371_v24  ;;  %4083 = vst [vmem:[#allocation97_spill] sm:$0xff] %v3301_v43  ;;  %vm822_vm0 = vcmp.lt.s32.totalorder %v3297_v31, 127 }
  0xcb   : > { %2230 = vrot.lane.b32.xlu1 %v2229_v38, %s2411_s15  ;;  %v2234_v38 = vpack.i.bf16 %v3245_v16, %v3243_v53  ;;  %v370_v16 = vld [vmem:[%s2573_s3 + $0x3f0] sm:$0xff]  ;;  %4080 = vst [vmem:[#allocation94_spill] sm:$0xff] %v3293_v57  ;;  %v2254_v11 = vpack.i.bf16 %v3295_v32, %v3293_v57 }
  0xcc   : > { %v434_v53 = vld [vmem:[%s2573_s3 + $0x7f0] sm:$0xff]  ;;  %4082 = vst [vmem:[#allocation96_spill] sm:$0xff] %v3299_v36 }
  0xcd   : > { %2225 = vrot.lane.b32.xlu0 %v2224_v6, %s2411_s15  ;;  %v242_v6 = vld [vmem:[%s2573_s3 + $0x3e0] sm:$0xff]  ;;  %v3305_v44 = vmax.f32 %v306_v50, %v434_v53  ;;  %v2269_v53 = vpack.i.bf16 %v3301_v43, %v3299_v36 }
  0xce   : > { %v3303_v14 = vmax.f32 %v242_v6, %v370_v16 }
  0xcf   : > { %2240 = vrot.lane.b32.xlu1 %v2239_v26, %s2411_s15  ;;  %4085 = vst [vmem:[#allocation99_spill] sm:$0xff] %v3305_v44 }
  0xd0   : > { %4084 = vst [vmem:[#allocation98_spill] sm:$0xff] %v3303_v14  ;;  %v2264_v16 = vpack.i.bf16 %v3305_v44, %v3303_v14 }
  0xd1   : > { %2235 = vrot.lane.b32.xlu0 %v2234_v38, %s2411_s15  ;;  %v1966_v26 = vpop.permute.xlu1 %1965  ;;  %v2259_v38 = vpack.i.bf16 %v3285_v30, %v3283_v61 }
  0xd2   : > { %v1968_v52 = vunpack.i.h.bf16 %v1966_v26  ;;  %v1967_v15 = vunpack.i.l.bf16 %v1966_v26 }
  0xd3   : > { %v1956_v62 = vpop.permute.xlu0 %1955  ;;  %2250 = vrot.lane.b32.xlu1 %v2249_v45, %s2411_s15 }
  0xd4   : > { %v1958_v10 = vunpack.i.h.bf16 %v1956_v62  ;;  %v1957_v51 = vunpack.i.l.bf16 %v1956_v62 }
  0xd5   : > { %2245 = vrot.lane.b32.xlu0 %v2244_v17, %s2411_s15  ;;  %v1971_v24 = vpop.permute.xlu1 %1970 }
  0xd6   : > { %v1973_v35 = vunpack.i.h.bf16 %v1971_v24  ;;  %v1972_v37 = vunpack.i.l.bf16 %v1971_v24 }
  0xd7   : > { %v1961_v58 = vpop.permute.xlu0 %1960  ;;  %2260 = vrot.lane.b32.xlu1 %v2259_v38, %s2411_s15 }
  0xd8   : > { %v1963_v6 = vunpack.i.h.bf16 %v1961_v58  ;;  %v1962_v45 = vunpack.i.l.bf16 %v1961_v58  ;;  %v888_v17 = vsel %vm822_vm0, %v1972_v37, %v1967_v15  ;;  %v920_v50 = vsel %vm822_vm0, %v1973_v35, %v1968_v52 }
  0xd9   : > { %2255 = vrot.lane.b32.xlu0 %v2254_v11, %s2411_s15  ;;  %v824_v26 = vsel %vm822_vm0, %v1967_v15, %v1972_v37  ;;  %v856_v24 = vsel %vm822_vm0, %v1968_v52, %v1973_v35  ;;  %v1981_v44 = vpop.permute.xlu1 %1980 }
  0xda   : > { %v887_v62 = vsel %vm822_vm0, %v1962_v45, %v1957_v51  ;;  %v919_v38 = vsel %vm822_vm0, %v1963_v6, %v1958_v10  ;;  %v823_v11 = vsel %vm822_vm0, %v1957_v51, %v1962_v45  ;;  %v855_v58 = vsel %vm822_vm0, %v1958_v10, %v1963_v6 }
  0xdb   : > { %v952_v14 = vmax.f32 %v2617_v25, %v887_v62  ;;  %v1016_v15 = vmax.f32 %v2624_v29, %v919_v38  ;;  %v951_v37 = vmax.f32 %v2598_v12, %v823_v11  ;;  %v1015_v52 = vmax.f32 %v2600_v13, %v855_v58  ;;  %v1976_v35 = vpop.permute.xlu0 %1975  ;;  %2270 = vrot.lane.b32.xlu1 %v2269_v53, %s2411_s15 }
  0xdc   : > { %v1983_v43 = vunpack.i.h.bf16 %v1981_v44  ;;  %v1982_v36 = vunpack.i.l.bf16 %v1981_v44  ;;  %v1978_v32 = vunpack.i.h.bf16 %v1976_v35  ;;  %v1977_v57 = vunpack.i.l.bf16 %v1976_v35 }
  0xdd   : > { %1175 = vmatprep.mubr.f32.mxu0 %v952_v14  ;;  %1335 = vmatprep.mubr.f32.mxu1 %v1016_v15  ;;  %v954_v10 = vmax.f32 %v2607_v18, %v888_v17  ;;  %v1018_v51 = vmax.f32 %v2609_v19, %v920_v50  ;;  %v953_v25 = vmax.f32 %v2589_v5, %v824_v26  ;;  %v1991_v13 = vpop.permute.xlu1 %1990 }
  0xde   : > { %1176 = vmatmul.mubr.f32.vlgmr.msra.gmra.mrb[0].mxu0 %v951_v37  ;;  %1336 = vmatmul.mubr.f32.vlgmr.msra.gmra.mrb[0].mxu1 %v1015_v52  ;;  %v1017_v12 = vmax.f32 %v2593_v8, %v856_v24  ;;  %v889_v29 = vsel %vm822_vm0, %v1982_v36, %v1977_v57  ;;  %v921_v44 = vsel %vm822_vm0, %v1983_v43, %v1978_v32  ;;  %v1993_v14 = vunpack.i.h.bf16 %v1991_v13 }
  0xdf   : > { %1180 = vmatprep.mubr.f32.mxu0 %v954_v10  ;;  %1340 = vmatprep.mubr.f32.mxu1 %v1018_v51  ;;  %v1992_v53 = vunpack.i.l.bf16 %v1991_v13  ;;  %v1986_v18 = vpop.permute.xlu0 %1985  ;;  %v956_v19 = vmax.f32 %v2630_v33, %v889_v29  ;;  %v1020_v5 = vmax.f32 %v2632_v34, %v921_v44  ;;  %v825_v45 = vsel %vm822_vm0, %v1977_v57, %v1982_v36 }
  0xe0   : > { %2265 = vrot.lane.b32.xlu0 %v2264_v16, %s2411_s15  ;;  %v1988_v6 = vunpack.i.h.bf16 %v1986_v18  ;;  %v1987_v8 = vunpack.i.l.bf16 %v1986_v18  ;;  %v857_v17 = vsel %vm822_vm0, %v1978_v32, %v1983_v43  ;;  %v955_v50 = vmax.f32 %v2639_v39, %v825_v45 }
  0xe1   : > { %v1019_v26 = vmax.f32 %v2641_v40, %v857_v17  ;;  %v2001_v24 = vpop.permute.xlu1 %2000 }
  0xe2   : > { %1181 = vmatmul.mubr.f32.gmra.mrb[2].mxu0 %v953_v25  ;;  %1341 = vmatmul.mubr.f32.gmra.mrb[2].mxu1 %v1017_v12  ;;  %v890_v33 = vsel %vm822_vm0, %v1992_v53, %v1987_v8  ;;  %v922_v34 = vsel %vm822_vm0, %v1993_v14, %v1988_v6  ;;  %v826_v16 = vsel %vm822_vm0, %v1987_v8, %v1992_v53  ;;  %v2003_v57 = vunpack.i.h.bf16 %v2001_v24 }
  0xe3   : > { %1185 = vmatprep.mubr.f32.mxu0 %v956_v19  ;;  %1345 = vmatprep.mubr.f32.mxu1 %v1020_v5  ;;  %v2002_v32 = vunpack.i.l.bf16 %v2001_v24  ;;  %v1996_v36 = vpop.permute.xlu0 %1995  ;;  %v958_v39 = vmax.f32 %v2652_v48, %v890_v33  ;;  %v1022_v40 = vmax.f32 %v2654_v49, %v922_v34  ;;  %v858_v38 = vsel %vm822_vm0, %v1988_v6, %v1993_v14 }
  0xe4   : > { %v1998_v43 = vunpack.i.h.bf16 %v1996_v36  ;;  %v1997_v62 = vunpack.i.l.bf16 %v1996_v36  ;;  %v957_v11 = vmax.f32 %v2662_v54, %v826_v16  ;;  %v1021_v58 = vmax.f32 %v2664_v55, %v858_v38 }
  0xe5   : > { %v2011_v15 = vpop.permute.xlu1 %2010 }
  0xe6   : > { %1186 = vmatmul.mubr.f32.gmra.mrb[4].mxu0 %v955_v50  ;;  %1346 = vmatmul.mubr.f32.gmra.mrb[4].mxu1 %v1019_v26  ;;  %v891_v37 = vsel %vm822_vm0, %v2002_v32, %v1997_v62  ;;  %v923_v48 = vsel %vm822_vm0, %v2003_v57, %v1998_v43  ;;  %v827_v49 = vsel %vm822_vm0, %v1997_v62, %v2002_v32  ;;  %v2013_v52 = vunpack.i.h.bf16 %v2011_v15 }
  0xe7   : > { %1190 = vmatprep.mubr.f32.mxu0 %v958_v39  ;;  %1350 = vmatprep.mubr.f32.mxu1 %v1022_v40  ;;  %v2012_v35 = vunpack.i.l.bf16 %v2011_v15  ;;  %v2006_v10 = vpop.permute.xlu0 %2005  ;;  %v960_v54 = vmax.f32 %v2676_v1, %v891_v37  ;;  %v1024_v55 = vmax.f32 %v2678_v2, %v923_v48  ;;  %v859_v12 = vsel %vm822_vm0, %v1998_v43, %v2003_v57 }
  0xe8   : > { %v2008_v51 = vunpack.i.h.bf16 %v2006_v10  ;;  %v2007_v25 = vunpack.i.l.bf16 %v2006_v10  ;;  %v959_v13 = vmax.f32 %v2685_v7, %v827_v49  ;;  %v1023_v29 = vmax.f32 %v2687_v9, %v859_v12 }
  0xe9   : > { %v2021_v44 = vpop.permute.xlu1 %2020 }
  0xea   : > { %1191 = vmatmul.mubr.f32.gmra.mrb[6].mxu0 %v957_v11  ;;  %1351 = vmatmul.mubr.f32.gmra.mrb[6].mxu1 %v1021_v58  ;;  %v892_v14 = vsel %vm822_vm0, %v2012_v35, %v2007_v25  ;;  %v924_v1 = vsel %vm822_vm0, %v2013_v52, %v2008_v51  ;;  %v828_v2 = vsel %vm822_vm0, %v2007_v25, %v2012_v35  ;;  %v2023_v53 = vunpack.i.h.bf16 %v2021_v44 }
  0xeb   : > { %1195 = vmatprep.mubr.f32.mxu0 %v960_v54  ;;  %1355 = vmatprep.mubr.f32.mxu1 %v1024_v55  ;;  %v2022_v18 = vunpack.i.l.bf16 %v2021_v44  ;;  %v2016_v19 = vpop.permute.xlu0 %2015  ;;  %v962_v7 = vmax.f32 %v2698_v21, %v892_v14  ;;  %v1026_v9 = vmax.f32 %v2700_v22, %v924_v1  ;;  %v860_v8 = vsel %vm822_vm0, %v2008_v51, %v2013_v52  ;;  %v4087_v44 = vld [vmem:[#allocation12_spill] sm:$0xff] }
  0xec   : > { %v2018_v5 = vunpack.i.h.bf16 %v2016_v19  ;;  %v2017_v6 = vunpack.i.l.bf16 %v2016_v19  ;;  %v961_v45 = vmax.f32 %v2707_v27, %v828_v2  ;;  %v1025_v17 = vmax.f32 %v2709_v28, %v860_v8 }
  0xed   : > { %v2031_v50 = vpop.permute.xlu1 %2030 }
  0xee   : > { %1196 = vmatmul.mubr.f32.gmra.mrb[8].mxu0 %v959_v13  ;;  %1356 = vmatmul.mubr.f32.gmra.mrb[8].mxu1 %v1023_v29  ;;  %v893_v26 = vsel %vm822_vm0, %v2022_v18, %v2017_v6  ;;  %v925_v21 = vsel %vm822_vm0, %v2023_v53, %v2018_v5  ;;  %v829_v22 = vsel %vm822_vm0, %v2017_v6, %v2022_v18  ;;  %v2033_v24 = vunpack.i.h.bf16 %v2031_v50  ;;  %v4086_v13 = vld [vmem:[#allocation11_spill] sm:$0xff] }
  0xef   : > { %1200 = vmatprep.mubr.f32.mxu0 %v962_v7  ;;  %1360 = vmatprep.mubr.f32.mxu1 %v1026_v9  ;;  %v2032_v33 = vunpack.i.l.bf16 %v2031_v50  ;;  %v2026_v34 = vpop.permute.xlu0 %2025  ;;  %v964_v27 = vmax.f32 %v2720_v41, %v893_v26  ;;  %v1028_v28 = vmax.f32 %v2722_v42, %v925_v21  ;;  %v861_v32 = vsel %vm822_vm0, %v2018_v5, %v2023_v53  ;;  %v4088_v7 = vld [vmem:[#allocation13_spill] sm:$0xff]  ;;  %v4089_v5 = vld [vmem:[#allocation14_spill] sm:$0xff]  ;;  %v4090_v50 = vld [vmem:[#allocation15_spill] sm:$0xff] }
  0xf0   : > { %v2028_v16 = vunpack.i.h.bf16 %v2026_v34  ;;  %v2027_v57 = vunpack.i.l.bf16 %v2026_v34  ;;  %v963_v36 = vmax.f32 %v2729_v46, %v829_v22  ;;  %v1027_v39 = vmax.f32 %v2731_v47, %v861_v32  ;;  %v4091_v21 = vld [vmem:[#allocation16_spill] sm:$0xff]  ;;  %v4092_v32 = vld [vmem:[#allocation17_spill] sm:$0xff] }
  0xf1   : > { %v2041_v40 = vpop.permute.xlu1 %2040 }
  0xf2   : > { %1201 = vmatmul.mubr.f32.gmra.mrb[10].mxu0 %v961_v45  ;;  %1361 = vmatmul.mubr.f32.gmra.mrb[10].mxu1 %v1025_v17  ;;  %v894_v43 = vsel %vm822_vm0, %v2032_v33, %v2027_v57  ;;  %v926_v41 = vsel %vm822_vm0, %v2033_v24, %v2028_v16  ;;  %v830_v42 = vsel %vm822_vm0, %v2027_v57, %v2032_v33  ;;  %v2043_v62 = vunpack.i.h.bf16 %v2041_v40 }
  0xf3   : > { %1205 = vmatprep.mubr.f32.mxu0 %v964_v27  ;;  %1365 = vmatprep.mubr.f32.mxu1 %v1028_v28  ;;  %v2042_v38 = vunpack.i.l.bf16 %v2041_v40  ;;  %v2036_v11 = vpop.permute.xlu0 %2035  ;;  %v966_v46 = vmax.f32 %v2742_v59, %v894_v43  ;;  %v1030_v47 = vmax.f32 %v2744_v60, %v926_v41  ;;  %v862_v37 = vsel %vm822_vm0, %v2028_v16, %v2033_v24 }
  0xf4   : > { %v2038_v58 = vunpack.i.h.bf16 %v2036_v11  ;;  %v2037_v15 = vunpack.i.l.bf16 %v2036_v11  ;;  %v965_v48 = vmax.f32 %v2751_v3, %v830_v42  ;;  %v1029_v49 = vmax.f32 %v2753_v4, %v862_v37  ;;  %v4095_v11 = vld [vmem:[#allocation20_spill] sm:$0xff] }
  0xf5   : > { %v2051_v52 = vpop.permute.xlu1 %2050 }
  0xf6   : > { %1206 = vmatmul.mubr.f32.gmra.mrb[12].mxu0 %v963_v36  ;;  %1366 = vmatmul.mubr.f32.gmra.mrb[12].mxu1 %v1027_v39  ;;  %v895_v35 = vsel %vm822_vm0, %v2042_v38, %v2037_v15  ;;  %v927_v59 = vsel %vm822_vm0, %v2043_v62, %v2038_v58  ;;  %v831_v60 = vsel %vm822_vm0, %v2037_v15, %v2042_v38  ;;  %v2053_v10 = vunpack.i.h.bf16 %v2051_v52  ;;  %v4093_v39 = vld [vmem:[#allocation18_spill] sm:$0xff] }
  0xf7   : > { %1210 = vmatprep.mubr.f32.mxu0 %v966_v46  ;;  %1370 = vmatprep.mubr.f32.mxu1 %v1030_v47  ;;  %v2052_v54 = vunpack.i.l.bf16 %v2051_v52  ;;  %v2046_v55 = vpop.permute.xlu0 %2045  ;;  %v968_v3 = vmax.f32 %v2764_v20, %v895_v35  ;;  %v1032_v4 = vmax.f32 %v2766_v23, %v927_v59  ;;  %v863_v12 = vsel %vm822_vm0, %v2038_v58, %v2043_v62  ;;  %v4094_v62 = vld [vmem:[#allocation19_spill] sm:$0xff]  ;;  %v4096_v35 = vld [vmem:[#allocation21_spill] sm:$0xff] }
  0xf8   : > { %v2048_v51 = vunpack.i.h.bf16 %v2046_v55  ;;  %v2047_v25 = vunpack.i.l.bf16 %v2046_v55  ;;  %v967_v29 = vmax.f32 %v4086_v13, %v831_v60  ;;  %v1031_v14 = vmax.f32 %v4087_v44, %v863_v12  ;;  %v4097_v60 = vld [vmem:[#allocation22_spill] sm:$0xff] }
  0xf9   : > { %v2061_v1 = vpop.permute.xlu1 %2060 }
  0xfa   : > { %1211 = vmatmul.mubr.f32.gmra.mrb[14].mxu0 %v965_v48  ;;  %1371 = vmatmul.mubr.f32.gmra.mrb[14].mxu1 %v1029_v49  ;;  %v896_v2 = vsel %vm822_vm0, %v2052_v54, %v2047_v25  ;;  %v928_v20 = vsel %vm822_vm0, %v2053_v10, %v2048_v51  ;;  %v832_v23 = vsel %vm822_vm0, %v2047_v25, %v2052_v54  ;;  %v2063_v53 = vunpack.i.h.bf16 %v2061_v1  ;;  %v4099_v25 = vld [vmem:[#allocation24_spill] sm:$0xff] }
  0xfb   : > { %1215 = vmatprep.mubr.f32.mxu0 %v968_v3  ;;  %1375 = vmatprep.mubr.f32.mxu1 %v1032_v4  ;;  %v2062_v18 = vunpack.i.l.bf16 %v2061_v1  ;;  %v2056_v19 = vpop.permute.xlu0 %2055  ;;  %v970_v9 = vmax.f32 %v4088_v7, %v896_v2  ;;  %v1034_v6 = vmax.f32 %v4089_v5, %v928_v20  ;;  %v864_v17 = vsel %vm822_vm0, %v2048_v51, %v2053_v10  ;;  %v4098_v4 = vld [vmem:[#allocation23_spill] sm:$0xff] }
  0xfc   : > { %v2058_v8 = vunpack.i.h.bf16 %v2056_v19  ;;  %v2057_v45 = vunpack.i.l.bf16 %v2056_v19  ;;  %v969_v26 = vmax.f32 %v4090_v50, %v832_v23  ;;  %v1033_v22 = vmax.f32 %v4091_v21, %v864_v17  ;;  %v4100_v23 = vld [vmem:[#allocation25_spill] sm:$0xff] }
  0xfd   : > { %v2071_v24 = vpop.permute.xlu1 %2070 }
  0xfe   : > { %1216 = vmatmul.mubr.f32.gmra.mrb[16].mxu0 %v967_v29  ;;  %1376 = vmatmul.mubr.f32.gmra.mrb[16].mxu1 %v1031_v14  ;;  %v897_v33 = vsel %vm822_vm0, %v2062_v18, %v2057_v45  ;;  %v929_v34 = vsel %vm822_vm0, %v2063_v53, %v2058_v8  ;;  %v833_v27 = vsel %vm822_vm0, %v2057_v45, %v2062_v18  ;;  %v2073_v28 = vunpack.i.h.bf16 %v2071_v24  ;;  %v4101_v18 = vld [vmem:[#allocation26_spill] sm:$0xff]  ;;  %v4103_v45 = vld [vmem:[#allocation28_spill] sm:$0xff] }
  0xff   : > { %1220 = vmatprep.mubr.f32.mxu0 %v970_v9  ;;  %1380 = vmatprep.mubr.f32.mxu1 %v1034_v6  ;;  %v2072_v16 = vunpack.i.l.bf16 %v2071_v24  ;;  %v2066_v57 = vpop.permute.xlu0 %2065  ;;  %v972_v36 = vmax.f32 %v4092_v32, %v897_v33  ;;  %v1036_v40 = vmax.f32 %v4093_v39, %v929_v34  ;;  %v865_v42 = vsel %vm822_vm0, %v2058_v8, %v2063_v53  ;;  %v4102_v6 = vld [vmem:[#allocation27_spill] sm:$0xff] }
 0x100   : > { %v2068_v43 = vunpack.i.h.bf16 %v2066_v57  ;;  %v2067_v41 = vunpack.i.l.bf16 %v2066_v57  ;;  %v971_v38 = vmax.f32 %v4094_v62, %v833_v27  ;;  %v1035_v46 = vmax.f32 %v4095_v11, %v865_v42  ;;  %v4104_v27 = vld [vmem:[#allocation29_spill] sm:$0xff] }
 0x101   : > { %v2081_v47 = vpop.permute.xlu1 %2080 }
 0x102   : > { %1221 = vmatmul.mubr.f32.gmra.mrb[18].mxu0 %v969_v26  ;;  %1381 = vmatmul.mubr.f32.gmra.mrb[18].mxu1 %v1033_v22  ;;  %v898_v58 = vsel %vm822_vm0, %v2072_v16, %v2067_v41  ;;  %v930_v15 = vsel %vm822_vm0, %v2073_v28, %v2068_v43  ;;  %v834_v37 = vsel %vm822_vm0, %v2067_v41, %v2072_v16  ;;  %v2083_v48 = vunpack.i.h.bf16 %v2081_v47  ;;  %v4105_v16 = vld [vmem:[#allocation30_spill] sm:$0xff]  ;;  %v4107_v41 = vld [vmem:[#allocation32_spill] sm:$0xff] }
 0x103   : > { %1225 = vmatprep.mubr.f32.mxu0 %v972_v36  ;;  %1385 = vmatprep.mubr.f32.mxu1 %v1036_v40  ;;  %v2082_v49 = vunpack.i.l.bf16 %v2081_v47  ;;  %v2076_v52 = vpop.permute.xlu0 %2075  ;;  %v974_v59 = vmax.f32 %v4096_v35, %v898_v58  ;;  %v1038_v10 = vmax.f32 %v4097_v60, %v930_v15  ;;  %v866_v3 = vsel %vm822_vm0, %v2068_v43, %v2073_v28  ;;  %v4106_v40 = vld [vmem:[#allocation31_spill] sm:$0xff] }
 0x104   : > { %v2078_v54 = vunpack.i.h.bf16 %v2076_v52  ;;  %v2077_v55 = vunpack.i.l.bf16 %v2076_v52  ;;  %v973_v51 = vmax.f32 %v4098_v4, %v834_v37  ;;  %v1037_v12 = vmax.f32 %v4099_v25, %v866_v3  ;;  %v4108_v37 = vld [vmem:[#allocation33_spill] sm:$0xff] }
 0x105   : > { %v2091_v13 = vpop.permute.xlu1 %2090 }
 0x106   : > { %1226 = vmatmul.mubr.f32.gmra.mrb[20].mxu0 %v971_v38  ;;  %1386 = vmatmul.mubr.f32.gmra.mrb[20].mxu1 %v1035_v46  ;;  %v899_v29 = vsel %vm822_vm0, %v2082_v49, %v2077_v55  ;;  %v931_v44 = vsel %vm822_vm0, %v2083_v48, %v2078_v54  ;;  %v835_v14 = vsel %vm822_vm0, %v2077_v55, %v2082_v49  ;;  %v2093_v1 = vunpack.i.h.bf16 %v2091_v13  ;;  %v4109_v49 = vld [vmem:[#allocation34_spill] sm:$0xff]  ;;  %v4111_v55 = vld [vmem:[#allocation36_spill] sm:$0xff] }
 0x107   : > { %1230 = vmatprep.mubr.f32.mxu0 %v974_v59  ;;  %1390 = vmatprep.mubr.f32.mxu1 %v1038_v10  ;;  %v2092_v2 = vunpack.i.l.bf16 %v2091_v13  ;;  %v2086_v20 = vpop.permute.xlu0 %2085  ;;  %v976_v53 = vmax.f32 %v4100_v23, %v899_v29  ;;  %v1040_v19 = vmax.f32 %v4101_v18, %v931_v44  ;;  %v867_v5 = vsel %vm822_vm0, %v2078_v54, %v2083_v48  ;;  %v4110_v10 = vld [vmem:[#allocation35_spill] sm:$0xff] }
 0x108   : > { %v2088_v7 = vunpack.i.h.bf16 %v2086_v20  ;;  %v2087_v9 = vunpack.i.l.bf16 %v2086_v20  ;;  %v975_v8 = vmax.f32 %v4102_v6, %v835_v14  ;;  %v1039_v17 = vmax.f32 %v4103_v45, %v867_v5  ;;  %v4112_v14 = vld [vmem:[#allocation37_spill] sm:$0xff] }
 0x109   : > { %v2101_v50 = vpop.permute.xlu1 %2100 }
 0x10a   : > { %1231 = vmatmul.mubr.f32.gmra.mrb[22].mxu0 %v973_v51  ;;  %1391 = vmatmul.mubr.f32.gmra.mrb[22].mxu1 %v1037_v12  ;;  %v900_v26 = vsel %vm822_vm0, %v2092_v2, %v2087_v9  ;;  %v932_v21 = vsel %vm822_vm0, %v2093_v1, %v2088_v7  ;;  %v836_v22 = vsel %vm822_vm0, %v2087_v9, %v2092_v2  ;;  %v2103_v24 = vunpack.i.h.bf16 %v2101_v50  ;;  %v4113_v2 = vld [vmem:[#allocation38_spill] sm:$0xff]  ;;  %v4115_v9 = vld [vmem:[#allocation40_spill] sm:$0xff] }
 0x10b   : > { %1235 = vmatprep.mubr.f32.mxu0 %v976_v53  ;;  %1395 = vmatprep.mubr.f32.mxu1 %v1040_v19  ;;  %v2102_v33 = vunpack.i.l.bf16 %v2101_v50  ;;  %v2096_v34 = vpop.permute.xlu0 %2095  ;;  %v978_v28 = vmax.f32 %v4104_v27, %v900_v26  ;;  %v1042_v57 = vmax.f32 %v4105_v16, %v932_v21  ;;  %v868_v39 = vsel %vm822_vm0, %v2088_v7, %v2093_v1  ;;  %v4114_v19 = vld [vmem:[#allocation39_spill] sm:$0xff] }
 0x10c   : > { %v2098_v32 = vunpack.i.h.bf16 %v2096_v34  ;;  %v2097_v36 = vunpack.i.l.bf16 %v2096_v34  ;;  %v977_v43 = vmax.f32 %v4106_v40, %v836_v22  ;;  %v1041_v42 = vmax.f32 %v4107_v41, %v868_v39  ;;  %v4116_v22 = vld [vmem:[#allocation41_spill] sm:$0xff] }
 0x10d   : > { %v2111_v62 = vpop.permute.xlu1 %2110 }
 0x10e   : > { %1236 = vmatmul.mubr.f32.gmra.mrb[24].mxu0 %v975_v8  ;;  %1396 = vmatmul.mubr.f32.gmra.mrb[24].mxu1 %v1039_v17  ;;  %v901_v38 = vsel %vm822_vm0, %v2102_v33, %v2097_v36  ;;  %v933_v11 = vsel %vm822_vm0, %v2103_v24, %v2098_v32  ;;  %v837_v46 = vsel %vm822_vm0, %v2097_v36, %v2102_v33  ;;  %v2113_v47 = vunpack.i.h.bf16 %v2111_v62  ;;  %v4117_v33 = vld [vmem:[#allocation42_spill] sm:$0xff]  ;;  %v4119_v36 = vld [vmem:[#allocation44_spill] sm:$0xff] }
 0x10f   : > { %1240 = vmatprep.mubr.f32.mxu0 %v978_v28  ;;  %1400 = vmatprep.mubr.f32.mxu1 %v1042_v57  ;;  %v2112_v58 = vunpack.i.l.bf16 %v2111_v62  ;;  %v2106_v15 = vpop.permute.xlu0 %2105  ;;  %v980_v48 = vmax.f32 %v4108_v37, %v901_v38  ;;  %v1044_v52 = vmax.f32 %v4109_v49, %v933_v11  ;;  %v869_v60 = vsel %vm822_vm0, %v2098_v32, %v2103_v24  ;;  %v4118_v57 = vld [vmem:[#allocation43_spill] sm:$0xff] }
 0x110   : > { %v2108_v35 = vunpack.i.h.bf16 %v2106_v15  ;;  %v2107_v59 = vunpack.i.l.bf16 %v2106_v15  ;;  %v979_v54 = vmax.f32 %v4110_v10, %v837_v46  ;;  %v1043_v3 = vmax.f32 %v4111_v55, %v869_v60  ;;  %v4120_v46 = vld [vmem:[#allocation45_spill] sm:$0xff] }
 0x111   : > { %v2121_v4 = vpop.permute.xlu1 %2120 }
 0x112   : > { %1241 = vmatmul.mubr.f32.gmra.mrb[26].mxu0 %v977_v43  ;;  %1401 = vmatmul.mubr.f32.gmra.mrb[26].mxu1 %v1041_v42  ;;  %v902_v51 = vsel %vm822_vm0, %v2112_v58, %v2107_v59  ;;  %v934_v25 = vsel %vm822_vm0, %v2113_v47, %v2108_v35  ;;  %v838_v12 = vsel %vm822_vm0, %v2107_v59, %v2112_v58  ;;  %v2123_v13 = vunpack.i.h.bf16 %v2121_v4  ;;  %v4121_v58 = vld [vmem:[#allocation46_spill] sm:$0xff]  ;;  %v4123_v59 = vld [vmem:[#allocation48_spill] sm:$0xff] }
 0x113   : > { %1245 = vmatprep.mubr.f32.mxu0 %v980_v48  ;;  %1405 = vmatprep.mubr.f32.mxu1 %v1044_v52  ;;  %v2122_v29 = vunpack.i.l.bf16 %v2121_v4  ;;  %v2116_v44 = vpop.permute.xlu0 %2115  ;;  %v982_v1 = vmax.f32 %v4112_v14, %v902_v51  ;;  %v1046_v20 = vmax.f32 %v4113_v2, %v934_v25  ;;  %v870_v18 = vsel %vm822_vm0, %v2108_v35, %v2113_v47  ;;  %v4122_v52 = vld [vmem:[#allocation47_spill] sm:$0xff] }
 0x114   : > { %v2118_v23 = vunpack.i.h.bf16 %v2116_v44  ;;  %v2117_v53 = vunpack.i.l.bf16 %v2116_v44  ;;  %v981_v7 = vmax.f32 %v4114_v19, %v838_v12  ;;  %v1045_v5 = vmax.f32 %v4115_v9, %v870_v18  ;;  %v4124_v12 = vld [vmem:[#allocation49_spill] sm:$0xff] }
 0x115   : > { %v2131_v6 = vpop.permute.xlu1 %2130 }
 0x116   : > { %1246 = vmatmul.mubr.f32.gmra.mrb[28].mxu0 %v979_v54  ;;  %1406 = vmatmul.mubr.f32.gmra.mrb[28].mxu1 %v1043_v3  ;;  %v903_v8 = vsel %vm822_vm0, %v2122_v29, %v2117_v53  ;;  %v935_v45 = vsel %vm822_vm0, %v2123_v13, %v2118_v23  ;;  %v839_v17 = vsel %vm822_vm0, %v2117_v53, %v2122_v29  ;;  %v2133_v50 = vunpack.i.h.bf16 %v2131_v6  ;;  %v4125_v29 = vld [vmem:[#allocation50_spill] sm:$0xff]  ;;  %v4127_v53 = vld [vmem:[#allocation52_spill] sm:$0xff] }
 0x117   : > { %1250 = vmatprep.mubr.f32.mxu0 %v982_v1  ;;  %1410 = vmatprep.mubr.f32.mxu1 %v1046_v20  ;;  %v2132_v26 = vunpack.i.l.bf16 %v2131_v6  ;;  %v2126_v21 = vpop.permute.xlu0 %2125  ;;  %v984_v24 = vmax.f32 %v4116_v22, %v903_v8  ;;  %v1048_v34 = vmax.f32 %v4117_v33, %v935_v45  ;;  %v871_v16 = vsel %vm822_vm0, %v2118_v23, %v2123_v13  ;;  %v4126_v20 = vld [vmem:[#allocation51_spill] sm:$0xff] }
 0x118   : > { %v2128_v27 = vunpack.i.h.bf16 %v2126_v21  ;;  %v2127_v28 = vunpack.i.l.bf16 %v2126_v21  ;;  %v983_v32 = vmax.f32 %v4118_v57, %v839_v17  ;;  %v1047_v39 = vmax.f32 %v4119_v36, %v871_v16  ;;  %v4128_v17 = vld [vmem:[#allocation53_spill] sm:$0xff] }
 0x119   : > { %v2141_v40 = vpop.permute.xlu1 %2140 }
 0x11a   : > { %1251 = vmatmul.mubr.f32.gmra.mrb[30].mxu0 %v981_v7  ;;  %1411 = vmatmul.mubr.f32.gmra.mrb[30].mxu1 %v1045_v5  ;;  %v904_v43 = vsel %vm822_vm0, %v2132_v26, %v2127_v28  ;;  %v936_v41 = vsel %vm822_vm0, %v2133_v50, %v2128_v27  ;;  %v840_v42 = vsel %vm822_vm0, %v2127_v28, %v2132_v26  ;;  %v2143_v62 = vunpack.i.h.bf16 %v2141_v40  ;;  %v4129_v26 = vld [vmem:[#allocation54_spill] sm:$0xff]  ;;  %v4131_v28 = vld [vmem:[#allocation56_spill] sm:$0xff] }
 0x11b   : > { %1255 = vmatprep.mubr.f32.mxu0 %v984_v24  ;;  %1415 = vmatprep.mubr.f32.mxu1 %v1048_v34  ;;  %v2142_v38 = vunpack.i.l.bf16 %v2141_v40  ;;  %v2136_v11 = vpop.permute.xlu0 %2135  ;;  %v986_v47 = vmax.f32 %v4120_v46, %v904_v43  ;;  %v1050_v15 = vmax.f32 %v4121_v58, %v936_v41  ;;  %v872_v49 = vsel %vm822_vm0, %v2128_v27, %v2133_v50  ;;  %v4130_v34 = vld [vmem:[#allocation55_spill] sm:$0xff] }
 0x11c   : > { %v2138_v37 = vunpack.i.h.bf16 %v2136_v11  ;;  %v2137_v48 = vunpack.i.l.bf16 %v2136_v11  ;;  %v985_v35 = vmax.f32 %v4122_v52, %v840_v42  ;;  %v1049_v60 = vmax.f32 %v4123_v59, %v872_v49  ;;  %v4132_v42 = vld [vmem:[#allocation57_spill] sm:$0xff] }
 0x11d   : > { %v2151_v10 = vpop.permute.xlu1 %2150 }
 0x11e   : > { %1256 = vmatmul.mubr.f32.gmra.mrb[32].mxu0 %v983_v32  ;;  %1416 = vmatmul.mubr.f32.gmra.mrb[32].mxu1 %v1047_v39  ;;  %v905_v54 = vsel %vm822_vm0, %v2142_v38, %v2137_v48  ;;  %v937_v55 = vsel %vm822_vm0, %v2143_v62, %v2138_v37  ;;  %v841_v3 = vsel %vm822_vm0, %v2137_v48, %v2142_v38  ;;  %v2153_v4 = vunpack.i.h.bf16 %v2151_v10  ;;  %v4133_v38 = vld [vmem:[#allocation58_spill] sm:$0xff]  ;;  %v4135_v48 = vld [vmem:[#allocation60_spill] sm:$0xff] }
 0x11f   : > { %1260 = vmatprep.mubr.f32.mxu0 %v986_v47  ;;  %1420 = vmatprep.mubr.f32.mxu1 %v1050_v15  ;;  %v2152_v51 = vunpack.i.l.bf16 %v2151_v10  ;;  %v2146_v25 = vpop.permute.xlu0 %2145  ;;  %v988_v13 = vmax.f32 %v4124_v12, %v905_v54  ;;  %v1052_v44 = vmax.f32 %v4125_v29, %v937_v55  ;;  %v873_v2 = vsel %vm822_vm0, %v2138_v37, %v2143_v62  ;;  %v4134_v15 = vld [vmem:[#allocation59_spill] sm:$0xff] }
 0x120   : > { %v2148_v14 = vunpack.i.h.bf16 %v2146_v25  ;;  %v2147_v1 = vunpack.i.l.bf16 %v2146_v25  ;;  %v987_v23 = vmax.f32 %v4126_v20, %v841_v3  ;;  %v1051_v18 = vmax.f32 %v4127_v53, %v873_v2  ;;  %v4136_v3 = vld [vmem:[#allocation61_spill] sm:$0xff] }
 0x121   : > { %v2161_v19 = vpop.permute.xlu1 %2160 }
 0x122   : > { %1261 = vmatmul.mubr.f32.gmra.mrb[34].mxu0 %v985_v35  ;;  %1421 = vmatmul.mubr.f32.gmra.mrb[34].mxu1 %v1049_v60  ;;  %v906_v7 = vsel %vm822_vm0, %v2152_v51, %v2147_v1  ;;  %v938_v9 = vsel %vm822_vm0, %v2153_v4, %v2148_v14  ;;  %v842_v5 = vsel %vm822_vm0, %v2147_v1, %v2152_v51  ;;  %v2163_v6 = vunpack.i.h.bf16 %v2161_v19  ;;  %v4137_v51 = vld [vmem:[#allocation62_spill] sm:$0xff]  ;;  %v4139_v1 = vld [vmem:[#allocation64_spill] sm:$0xff] }
 0x123   : > { %1265 = vmatprep.mubr.f32.mxu0 %v988_v13  ;;  %1425 = vmatprep.mubr.f32.mxu1 %v1052_v44  ;;  %v2162_v8 = vunpack.i.l.bf16 %v2161_v19  ;;  %v2156_v45 = vpop.permute.xlu0 %2155  ;;  %v990_v50 = vmax.f32 %v4128_v17, %v906_v7  ;;  %v1054_v21 = vmax.f32 %v4129_v26, %v938_v9  ;;  %v874_v33 = vsel %vm822_vm0, %v2148_v14, %v2153_v4  ;;  %v4138_v44 = vld [vmem:[#allocation63_spill] sm:$0xff] }
 0x124   : > { %v2158_v22 = vunpack.i.h.bf16 %v2156_v45  ;;  %v2157_v24 = vunpack.i.l.bf16 %v2156_v45  ;;  %v989_v27 = vmax.f32 %v4130_v34, %v842_v5  ;;  %v1053_v16 = vmax.f32 %v4131_v28, %v874_v33  ;;  %v4140_v5 = vld [vmem:[#allocation65_spill] sm:$0xff] }
 0x125   : > { %v2171_v57 = vpop.permute.xlu1 %2170 }
 0x126   : > { %1266 = vmatmul.mubr.f32.gmra.mrb[36].mxu0 %v987_v23  ;;  %1426 = vmatmul.mubr.f32.gmra.mrb[36].mxu1 %v1051_v18  ;;  %v907_v32 = vsel %vm822_vm0, %v2162_v8, %v2157_v24  ;;  %v939_v36 = vsel %vm822_vm0, %v2163_v6, %v2158_v22  ;;  %v843_v39 = vsel %vm822_vm0, %v2157_v24, %v2162_v8  ;;  %v2173_v40 = vunpack.i.h.bf16 %v2171_v57  ;;  %v4141_v8 = vld [vmem:[#allocation66_spill] sm:$0xff]  ;;  %v4143_v24 = vld [vmem:[#allocation68_spill] sm:$0xff] }
 0x127   : > { %1270 = vmatprep.mubr.f32.mxu0 %v990_v50  ;;  %1430 = vmatprep.mubr.f32.mxu1 %v1054_v21  ;;  %v2172_v43 = vunpack.i.l.bf16 %v2171_v57  ;;  %v2166_v41 = vpop.permute.xlu0 %2165  ;;  %v992_v62 = vmax.f32 %v4132_v42, %v907_v32  ;;  %v1056_v11 = vmax.f32 %v4133_v38, %v939_v36  ;;  %v875_v58 = vsel %vm822_vm0, %v2158_v22, %v2163_v6  ;;  %v4142_v21 = vld [vmem:[#allocation67_spill] sm:$0xff] }
 0x128   : > { %v2168_v46 = vunpack.i.h.bf16 %v2166_v41  ;;  %v2167_v47 = vunpack.i.l.bf16 %v2166_v41  ;;  %v991_v37 = vmax.f32 %v4134_v15, %v843_v39  ;;  %v1055_v49 = vmax.f32 %v4135_v48, %v875_v58  ;;  %v4144_v39 = vld [vmem:[#allocation69_spill] sm:$0xff] }
 0x129   : > { %v2181_v52 = vpop.permute.xlu1 %2180 }
 0x12a   : > { %1271 = vmatmul.mubr.f32.gmra.mrb[38].mxu0 %v989_v27  ;;  %1431 = vmatmul.mubr.f32.gmra.mrb[38].mxu1 %v1053_v16  ;;  %v908_v35 = vsel %vm822_vm0, %v2172_v43, %v2167_v47  ;;  %v940_v59 = vsel %vm822_vm0, %v2173_v40, %v2168_v46  ;;  %v844_v60 = vsel %vm822_vm0, %v2167_v47, %v2172_v43  ;;  %v2183_v10 = vunpack.i.h.bf16 %v2181_v52  ;;  %v4145_v43 = vld [vmem:[#allocation70_spill] sm:$0xff]  ;;  %v4147_v47 = vld [vmem:[#allocation72_spill] sm:$0xff] }
 0x12b   : > { %1275 = vmatprep.mubr.f32.mxu0 %v992_v62  ;;  %1435 = vmatprep.mubr.f32.mxu1 %v1056_v11  ;;  %v2182_v54 = vunpack.i.l.bf16 %v2181_v52  ;;  %v2176_v55 = vpop.permute.xlu0 %2175  ;;  %v994_v4 = vmax.f32 %v4136_v3, %v908_v35  ;;  %v1058_v25 = vmax.f32 %v4137_v51, %v940_v59  ;;  %v876_v29 = vsel %vm822_vm0, %v2168_v46, %v2173_v40  ;;  %v4146_v11 = vld [vmem:[#allocation71_spill] sm:$0xff] }
 0x12c   : > { %v2178_v12 = vunpack.i.h.bf16 %v2176_v55  ;;  %v2177_v13 = vunpack.i.l.bf16 %v2176_v55  ;;  %v993_v14 = vmax.f32 %v4138_v44, %v844_v60  ;;  %v1057_v2 = vmax.f32 %v4139_v1, %v876_v29  ;;  %v4148_v60 = vld [vmem:[#allocation73_spill] sm:$0xff] }
 0x12d   : > { %v2191_v20 = vpop.permute.xlu1 %2190 }
 0x12e   : > { %1276 = vmatmul.mubr.f32.gmra.mrb[40].mxu0 %v991_v37  ;;  %1436 = vmatmul.mubr.f32.gmra.mrb[40].mxu1 %v1055_v49  ;;  %v909_v23 = vsel %vm822_vm0, %v2182_v54, %v2177_v13  ;;  %v941_v53 = vsel %vm822_vm0, %v2183_v10, %v2178_v12  ;;  %v845_v18 = vsel %vm822_vm0, %v2177_v13, %v2182_v54  ;;  %v2193_v19 = vunpack.i.h.bf16 %v2191_v20  ;;  %v4149_v54 = vld [vmem:[#allocation74_spill] sm:$0xff]  ;;  %v4151_v13 = vld [vmem:[#allocation76_spill] sm:$0xff] }
 0x12f   : > { %1280 = vmatprep.mubr.f32.mxu0 %v994_v4  ;;  %1440 = vmatprep.mubr.f32.mxu1 %v1058_v25  ;;  %v2192_v7 = vunpack.i.l.bf16 %v2191_v20  ;;  %v2186_v9 = vpop.permute.xlu0 %2185  ;;  %v996_v6 = vmax.f32 %v4140_v5, %v909_v23  ;;  %v1060_v45 = vmax.f32 %v4141_v8, %v941_v53  ;;  %v877_v26 = vsel %vm822_vm0, %v2178_v12, %v2183_v10  ;;  %v4150_v25 = vld [vmem:[#allocation75_spill] sm:$0xff] }
 0x130   : > { %v2188_v17 = vunpack.i.h.bf16 %v2186_v9  ;;  %v2187_v50 = vunpack.i.l.bf16 %v2186_v9  ;;  %v995_v22 = vmax.f32 %v4142_v21, %v845_v18  ;;  %v1059_v33 = vmax.f32 %v4143_v24, %v877_v26  ;;  %v4152_v18 = vld [vmem:[#allocation77_spill] sm:$0xff] }
 0x131   : > { %v2201_v34 = vpop.permute.xlu1 %2200 }
 0x132   : > { %1281 = vmatmul.mubr.f32.gmra.mrb[42].mxu0 %v993_v14  ;;  %1441 = vmatmul.mubr.f32.gmra.mrb[42].mxu1 %v1057_v2  ;;  %v910_v27 = vsel %vm822_vm0, %v2192_v7, %v2187_v50  ;;  %v942_v28 = vsel %vm822_vm0, %v2193_v19, %v2188_v17  ;;  %v846_v16 = vsel %vm822_vm0, %v2187_v50, %v2192_v7  ;;  %v2203_v57 = vunpack.i.h.bf16 %v2201_v34  ;;  %v4153_v7 = vld [vmem:[#allocation78_spill] sm:$0xff]  ;;  %v4155_v50 = vld [vmem:[#allocation80_spill] sm:$0xff] }
 0x133   : > { %1285 = vmatprep.mubr.f32.mxu0 %v996_v6  ;;  %1445 = vmatprep.mubr.f32.mxu1 %v1060_v45  ;;  %v2202_v32 = vunpack.i.l.bf16 %v2201_v34  ;;  %v2196_v36 = vpop.permute.xlu0 %2195  ;;  %v998_v40 = vmax.f32 %v4144_v39, %v910_v27  ;;  %v1062_v41 = vmax.f32 %v4145_v43, %v942_v28  ;;  %v878_v38 = vsel %vm822_vm0, %v2188_v17, %v2193_v19  ;;  %v4154_v45 = vld [vmem:[#allocation79_spill] sm:$0xff] }
 0x134   : > { %v2198_v42 = vunpack.i.h.bf16 %v2196_v36  ;;  %v2197_v62 = vunpack.i.l.bf16 %v2196_v36  ;;  %v997_v46 = vmax.f32 %v4146_v11, %v846_v16  ;;  %v1061_v58 = vmax.f32 %v4147_v47, %v878_v38  ;;  %v4156_v16 = vld [vmem:[#allocation81_spill] sm:$0xff] }
 0x135   : > { %v2211_v15 = vpop.permute.xlu1 %2210 }
 0x136   : > { %1286 = vmatmul.mubr.f32.gmra.mrb[44].mxu0 %v995_v22  ;;  %1446 = vmatmul.mubr.f32.gmra.mrb[44].mxu1 %v1059_v33  ;;  %v911_v37 = vsel %vm822_vm0, %v2202_v32, %v2197_v62  ;;  %v943_v48 = vsel %vm822_vm0, %v2203_v57, %v2198_v42  ;;  %v847_v49 = vsel %vm822_vm0, %v2197_v62, %v2202_v32  ;;  %v2213_v52 = vunpack.i.h.bf16 %v2211_v15  ;;  %v4157_v32 = vld [vmem:[#allocation82_spill] sm:$0xff]  ;;  %v4159_v62 = vld [vmem:[#allocation84_spill] sm:$0xff] }
 0x137   : > { %1290 = vmatprep.mubr.f32.mxu0 %v998_v40  ;;  %1450 = vmatprep.mubr.f32.mxu1 %v1062_v41  ;;  %v2212_v35 = vunpack.i.l.bf16 %v2211_v15  ;;  %v2206_v59 = vpop.permute.xlu0 %2205  ;;  %v1000_v10 = vmax.f32 %v4148_v60, %v911_v37  ;;  %v1064_v55 = vmax.f32 %v4149_v54, %v943_v48  ;;  %v879_v51 = vsel %vm822_vm0, %v2198_v42, %v2203_v57  ;;  %v4158_v41 = vld [vmem:[#allocation83_spill] sm:$0xff] }
 0x138   : > { %v2208_v3 = vunpack.i.h.bf16 %v2206_v59  ;;  %v2207_v4 = vunpack.i.l.bf16 %v2206_v59  ;;  %v999_v12 = vmax.f32 %v4150_v25, %v847_v49  ;;  %v1063_v29 = vmax.f32 %v4151_v13, %v879_v51  ;;  %v4160_v49 = vld [vmem:[#allocation85_spill] sm:$0xff] }
 0x139   : > { %v2221_v44 = vpop.permute.xlu1 %2220 }
 0x13a   : > { %1291 = vmatmul.mubr.f32.gmra.mrb[46].mxu0 %v997_v46  ;;  %1451 = vmatmul.mubr.f32.gmra.mrb[46].mxu1 %v1061_v58  ;;  %v912_v14 = vsel %vm822_vm0, %v2212_v35, %v2207_v4  ;;  %v944_v1 = vsel %vm822_vm0, %v2213_v52, %v2208_v3  ;;  %v848_v2 = vsel %vm822_vm0, %v2207_v4, %v2212_v35  ;;  %v2223_v20 = vunpack.i.h.bf16 %v2221_v44  ;;  %v4161_v35 = vld [vmem:[#allocation86_spill] sm:$0xff]  ;;  %v4163_v4 = vld [vmem:[#allocation88_spill] sm:$0xff] }
 0x13b   : > { %1295 = vmatprep.mubr.f32.mxu0 %v1000_v10  ;;  %1455 = vmatprep.mubr.f32.mxu1 %v1064_v55  ;;  %v2222_v23 = vunpack.i.l.bf16 %v2221_v44  ;;  %v2216_v53 = vpop.permute.xlu0 %2215  ;;  %v1002_v19 = vmax.f32 %v4152_v18, %v912_v14  ;;  %v1066_v9 = vmax.f32 %v4153_v7, %v944_v1  ;;  %v880_v8 = vsel %vm822_vm0, %v2208_v3, %v2213_v52  ;;  %v4162_v55 = vld [vmem:[#allocation87_spill] sm:$0xff] }
 0x13c   : > { %v2218_v5 = vunpack.i.h.bf16 %v2216_v53  ;;  %v2217_v6 = vunpack.i.l.bf16 %v2216_v53  ;;  %v1001_v17 = vmax.f32 %v4154_v45, %v848_v2  ;;  %v1065_v26 = vmax.f32 %v4155_v50, %v880_v8  ;;  %v4164_v2 = vld [vmem:[#allocation89_spill] sm:$0xff] }
 0x13d   : > { %v2231_v21 = vpop.permute.xlu1 %2230 }
 0x13e   : > { %1296 = vmatmul.mubr.f32.gmra.mrb[48].mxu0 %v999_v12  ;;  %1456 = vmatmul.mubr.f32.gmra.mrb[48].mxu1 %v1063_v29  ;;  %v913_v22 = vsel %vm822_vm0, %v2222_v23, %v2217_v6  ;;  %v945_v24 = vsel %vm822_vm0, %v2223_v20, %v2218_v5  ;;  %v849_v33 = vsel %vm822_vm0, %v2217_v6, %v2222_v23  ;;  %v2233_v34 = vunpack.i.h.bf16 %v2231_v21  ;;  %v4165_v23 = vld [vmem:[#allocation90_spill] sm:$0xff]  ;;  %v4167_v6 = vld [vmem:[#allocation92_spill] sm:$0xff] }
 0x13f   : > { %1300 = vmatprep.mubr.f32.mxu0 %v1002_v19  ;;  %1460 = vmatprep.mubr.f32.mxu1 %v1066_v9  ;;  %v2232_v27 = vunpack.i.l.bf16 %v2231_v21  ;;  %v2226_v28 = vpop.permute.xlu0 %2225  ;;  %v1004_v57 = vmax.f32 %v4156_v16, %v913_v22  ;;  %v1068_v36 = vmax.f32 %v4157_v32, %v945_v24  ;;  %v881_v43 = vsel %vm822_vm0, %v2218_v5, %v2223_v20  ;;  %v4166_v9 = vld [vmem:[#allocation91_spill] sm:$0xff] }
 0x140   : > { %v2228_v39 = vunpack.i.h.bf16 %v2226_v28  ;;  %v2227_v40 = vunpack.i.l.bf16 %v2226_v28  ;;  %v1003_v42 = vmax.f32 %v4158_v41, %v849_v33  ;;  %v1067_v38 = vmax.f32 %v4159_v62, %v881_v43 }
 0x141   : > { %v2241_v11 = vpop.permute.xlu1 %2240 }
 0x142   : > { %1301 = vmatmul.mubr.f32.gmra.mrb[50].mxu0 %v1001_v17  ;;  %1461 = vmatmul.mubr.f32.gmra.mrb[50].mxu1 %v1065_v26  ;;  %v914_v46 = vsel %vm822_vm0, %v2232_v27, %v2227_v40  ;;  %v946_v47 = vsel %vm822_vm0, %v2233_v34, %v2228_v39  ;;  %v850_v58 = vsel %vm822_vm0, %v2227_v40, %v2232_v27  ;;  %v2243_v15 = vunpack.i.h.bf16 %v2241_v11 }
 0x143   : > { %1305 = vmatprep.mubr.f32.mxu0 %v1004_v57  ;;  %1465 = vmatprep.mubr.f32.mxu1 %v1068_v36  ;;  %v2242_v37 = vunpack.i.l.bf16 %v2241_v11  ;;  %v2236_v48 = vpop.permute.xlu0 %2235  ;;  %v1006_v52 = vmax.f32 %v4160_v49, %v914_v46  ;;  %v1070_v59 = vmax.f32 %v4161_v35, %v946_v47  ;;  %v882_v54 = vsel %vm822_vm0, %v2228_v39, %v2233_v34  ;;  %v4168_v34 = vld [vmem:[#allocation93_spill] sm:$0xff]  ;;  %v4169_v11 = vld [vmem:[#allocation94_spill] sm:$0xff]  ;;  %v4170_v47 = vld [vmem:[#allocation95_spill] sm:$0xff] }
 0x144   : > { %v2238_v60 = vunpack.i.h.bf16 %v2236_v48  ;;  %v2237_v10 = vunpack.i.l.bf16 %v2236_v48  ;;  %v1005_v3 = vmax.f32 %v4162_v55, %v850_v58  ;;  %v1069_v51 = vmax.f32 %v4163_v4, %v882_v54  ;;  %v4174_v55 = vld [vmem:[#allocation99_spill] sm:$0xff] }
 0x145   : > { %v2251_v25 = vpop.permute.xlu1 %2250 }
 0x146   : > { %1306 = vmatmul.mubr.f32.gmra.mrb[52].mxu0 %v1003_v42  ;;  %1466 = vmatmul.mubr.f32.gmra.mrb[52].mxu1 %v1067_v38  ;;  %v915_v12 = vsel %vm822_vm0, %v2242_v37, %v2237_v10  ;;  %v947_v13 = vsel %vm822_vm0, %v2243_v15, %v2238_v60  ;;  %v851_v29 = vsel %vm822_vm0, %v2237_v10, %v2242_v37  ;;  %v2253_v44 = vunpack.i.h.bf16 %v2251_v25  ;;  %v4173_v10 = vld [vmem:[#allocation98_spill] sm:$0xff] }
 0x147   : > { %1310 = vmatprep.mubr.f32.mxu0 %v1006_v52  ;;  %1470 = vmatprep.mubr.f32.mxu1 %v1070_v59  ;;  %v2252_v14 = vunpack.i.l.bf16 %v2251_v25  ;;  %v2246_v1 = vpop.permute.xlu0 %2245  ;;  %v1008_v20 = vmax.f32 %v4164_v2, %v915_v12  ;;  %v1072_v53 = vmax.f32 %v4165_v23, %v947_v13  ;;  %v883_v7 = vsel %vm822_vm0, %v2238_v60, %v2243_v15  ;;  %v4171_v52 = vld [vmem:[#allocation96_spill] sm:$0xff]  ;;  %v4172_v59 = vld [vmem:[#allocation97_spill] sm:$0xff] }
 0x148   : > { %v2248_v18 = vunpack.i.h.bf16 %v2246_v1  ;;  %v2247_v19 = vunpack.i.l.bf16 %v2246_v1  ;;  %v1007_v5 = vmax.f32 %v4166_v9, %v851_v29  ;;  %v1071_v8 = vmax.f32 %v4167_v6, %v883_v7 }
 0x149   : > { %v2261_v45 = vpop.permute.xlu1 %2260 }
 0x14a   : > { %1311 = vmatmul.mubr.f32.gmra.mrb[54].mxu0 %v1005_v3  ;;  %1471 = vmatmul.mubr.f32.gmra.mrb[54].mxu1 %v1069_v51  ;;  %v916_v17 = vsel %vm822_vm0, %v2252_v14, %v2247_v19  ;;  %v948_v50 = vsel %vm822_vm0, %v2253_v44, %v2248_v18  ;;  %v852_v26 = vsel %vm822_vm0, %v2247_v19, %v2252_v14  ;;  %v2263_v21 = vunpack.i.h.bf16 %v2261_v45 }
 0x14b   : > { %1315 = vmatprep.mubr.f32.mxu0 %v1008_v20  ;;  %1475 = vmatprep.mubr.f32.mxu1 %v1072_v53  ;;  %v2262_v22 = vunpack.i.l.bf16 %v2261_v45  ;;  %v2256_v24 = vpop.permute.xlu0 %2255  ;;  %v1010_v33 = vmax.f32 %v3257_v0, %v916_v17  ;;  %v1074_v27 = vmax.f32 %v4168_v34, %v948_v50  ;;  %v884_v57 = vsel %vm822_vm0, %v2248_v18, %v2253_v44 }
 0x14c   : > { %v2258_v28 = vunpack.i.h.bf16 %v2256_v24  ;;  %v2257_v16 = vunpack.i.l.bf16 %v2256_v24  ;;  %v1009_v32 = vmax.f32 %v3267_v56, %v852_v26  ;;  %v1073_v36 = vmax.f32 %v3269_v63, %v884_v57 }
 0x14d   : > { %v2271_v39 = vpop.permute.xlu1 %2270 }
 0x14e   : > { %1316 = vmatmul.mubr.f32.gmra.mrb[56].mxu0 %v1007_v5  ;;  %1476 = vmatmul.mubr.f32.gmra.mrb[56].mxu1 %v1071_v8  ;;  %v917_v40 = vsel %vm822_vm0, %v2262_v22, %v2257_v16  ;;  %v949_v0 = vsel %vm822_vm0, %v2263_v21, %v2258_v28  ;;  %v853_v56 = vsel %vm822_vm0, %v2257_v16, %v2262_v22  ;;  %v2273_v63 = vunpack.i.h.bf16 %v2271_v39 }
 0x14f   : > { %1320 = vmatprep.mubr.f32.mxu0 %v1010_v33  ;;  %1480 = vmatprep.mubr.f32.mxu1 %v1074_v27  ;;  %v1012_v43 = vmax.f32 %v3283_v61, %v917_v40  ;;  %v1076_v41 = vmax.f32 %v3285_v30, %v949_v0  ;;  %v885_v42 = vsel %vm822_vm0, %v2258_v28, %v2263_v21  ;;  %v2272_v62 = vunpack.i.l.bf16 %v2271_v39 }
 0x150   : > { %v1011_v46 = vmax.f32 %v4169_v11, %v853_v56  ;;  %v1075_v58 = vmax.f32 %v4170_v47, %v885_v42 }
 0x152   : > { %1321 = vmatmul.mubr.f32.gmra.mrb[58].mxu0 %v1009_v32  ;;  %1481 = vmatmul.mubr.f32.gmra.mrb[58].mxu1 %v1073_v36  ;;  %v2266_v38 = vpop.permute.xlu0 %2265 }
 0x153   : > { %v2268_v15 = vunpack.i.h.bf16 %v2266_v38  ;;  %v2267_v37 = vunpack.i.l.bf16 %v2266_v38  ;;  %1325 = vmatprep.mubr.f32.mxu0 %v1012_v43  ;;  %1485 = vmatprep.mubr.f32.mxu1 %v1076_v41 }
 0x155   : > { %v918_v61 = vsel %vm822_vm0, %v2272_v62, %v2267_v37  ;;  %v950_v30 = vsel %vm822_vm0, %v2273_v63, %v2268_v15  ;;  %v854_v48 = vsel %vm822_vm0, %v2267_v37, %v2272_v62  ;;  %v886_v49 = vsel %vm822_vm0, %v2268_v15, %v2273_v63 }
 0x156   : > { %1326 = vmatmul.mubr.f32.gmra.mrb[60].mxu0 %v1011_v46  ;;  %1486 = vmatmul.mubr.f32.gmra.mrb[60].mxu1 %v1075_v58  ;;  %v1014_v35 = vmax.f32 %v4171_v52, %v918_v61  ;;  %v1078_v60 = vmax.f32 %v4172_v59, %v950_v30  ;;  %v1013_v54 = vmax.f32 %v4173_v10, %v854_v48 }
 0x157   : > { %v1077_v3 = vmax.f32 %v4174_v55, %v886_v49 }
 0x158   : > { %1330 = vmatprep.mubr.f32.mxu0 %v1014_v35  ;;  %1490 = vmatprep.mubr.f32.mxu1 %v1078_v60 }
 0x15a   : > { %1331 = vmatmul.mubr.f32.gmra.mrb[62].mxu0 %v1013_v54  ;;  %1491 = vmatmul.mubr.f32.gmra.mrb[62].mxu1 %v1077_v3 }
 0x1b1   : > { %v1177_v4 = vpop.f32.mrb[0].mxu0  ;;  %v1337_v51 = vpop.f32.mrb[0].mxu1 }
 0x1b2   : > { %1496 = vst [vmem:[%s3707_s27] sm:$0xff] %v1177_v4  ;;  %1735 = vst [vmem:[%s3707_s27 + $0x80] sm:$0xff] %v1177_v4  ;;  %v1179_v31 = vpop.f32.mrb[1].mxu0  ;;  %v1339_v25 = vpop.f32.mrb[1].mxu1 }
 0x1b3   : > { %1528 = vst [vmem:[%s3707_s27 + $0x200] sm:$0xff] %v1337_v51  ;;  %1767 = vst [vmem:[%s3707_s27 + $0x280] sm:$0xff] %v1337_v51 }
 0x1b5   : > { %v1182_v12 = vpop.f32.mrb[2].mxu0  ;;  %v1342_v13 = vpop.f32.mrb[2].mxu1 }
 0x1b6   : > { %1497 = vst [vmem:[%s3707_s27 + $0x8] sm:$0xff] %v1182_v12  ;;  %1736 = vst [vmem:[%s3707_s27 + $0x88] sm:$0xff] %v1182_v12  ;;  %v1184_v29 = vpop.f32.mrb[3].mxu0  ;;  %v1344_v44 = vpop.f32.mrb[3].mxu1 }
 0x1b7   : > { %1529 = vst [vmem:[%s3707_s27 + $0x208] sm:$0xff] %v1342_v13  ;;  %1768 = vst [vmem:[%s3707_s27 + $0x288] sm:$0xff] %v1342_v13 }
 0x1b9   : > { %v1187_v14 = vpop.f32.mrb[4].mxu0  ;;  %v1347_v1 = vpop.f32.mrb[4].mxu1 }
 0x1ba   : > { %1498 = vst [vmem:[%s3707_s27 + $0x10] sm:$0xff] %v1187_v14  ;;  %1737 = vst [vmem:[%s3707_s27 + $0x90] sm:$0xff] %v1187_v14  ;;  %v1189_v2 = vpop.f32.mrb[5].mxu0  ;;  %v1349_v20 = vpop.f32.mrb[5].mxu1 }
 0x1bb   : > { %1530 = vst [vmem:[%s3707_s27 + $0x210] sm:$0xff] %v1347_v1  ;;  %1769 = vst [vmem:[%s3707_s27 + $0x290] sm:$0xff] %v1347_v1 }
 0x1bd   : > { %v1192_v23 = vpop.f32.mrb[6].mxu0  ;;  %v1352_v53 = vpop.f32.mrb[6].mxu1 }
 0x1be   : > { %1499 = vst [vmem:[%s3707_s27 + $0x18] sm:$0xff] %v1192_v23  ;;  %1738 = vst [vmem:[%s3707_s27 + $0x98] sm:$0xff] %v1192_v23  ;;  %v1194_v18 = vpop.f32.mrb[7].mxu0  ;;  %v1354_v19 = vpop.f32.mrb[7].mxu1 }
 0x1bf   : > { %1531 = vst [vmem:[%s3707_s27 + $0x218] sm:$0xff] %v1352_v53  ;;  %1770 = vst [vmem:[%s3707_s27 + $0x298] sm:$0xff] %v1352_v53 }
 0x1c1   : > { %v1197_v7 = vpop.f32.mrb[8].mxu0  ;;  %v1357_v9 = vpop.f32.mrb[8].mxu1 }
 0x1c2   : > { %1500 = vst [vmem:[%s3707_s27 + $0x20] sm:$0xff] %v1197_v7  ;;  %1739 = vst [vmem:[%s3707_s27 + $0xa0] sm:$0xff] %v1197_v7  ;;  %v1199_v5 = vpop.f32.mrb[9].mxu0  ;;  %v1359_v6 = vpop.f32.mrb[9].mxu1 }
 0x1c3   : > { %1532 = vst [vmem:[%s3707_s27 + $0x220] sm:$0xff] %v1357_v9  ;;  %1771 = vst [vmem:[%s3707_s27 + $0x2a0] sm:$0xff] %v1357_v9 }
 0x1c5   : > { %v1202_v8 = vpop.f32.mrb[10].mxu0  ;;  %v1362_v45 = vpop.f32.mrb[10].mxu1 }
 0x1c6   : > { %1501 = vst [vmem:[%s3707_s27 + $0x28] sm:$0xff] %v1202_v8  ;;  %1740 = vst [vmem:[%s3707_s27 + $0xa8] sm:$0xff] %v1202_v8  ;;  %v1204_v17 = vpop.f32.mrb[11].mxu0  ;;  %v1364_v50 = vpop.f32.mrb[11].mxu1 }
 0x1c7   : > { %1533 = vst [vmem:[%s3707_s27 + $0x228] sm:$0xff] %v1362_v45  ;;  %1772 = vst [vmem:[%s3707_s27 + $0x2a8] sm:$0xff] %v1362_v45 }
 0x1c9   : > { %v1207_v26 = vpop.f32.mrb[12].mxu0  ;;  %v1367_v21 = vpop.f32.mrb[12].mxu1 }
 0x1ca   : > { %1502 = vst [vmem:[%s3707_s27 + $0x30] sm:$0xff] %v1207_v26  ;;  %1741 = vst [vmem:[%s3707_s27 + $0xb0] sm:$0xff] %v1207_v26  ;;  %v1209_v22 = vpop.f32.mrb[13].mxu0  ;;  %v1369_v24 = vpop.f32.mrb[13].mxu1 }
 0x1cb   : > { %1534 = vst [vmem:[%s3707_s27 + $0x230] sm:$0xff] %v1367_v21  ;;  %1773 = vst [vmem:[%s3707_s27 + $0x2b0] sm:$0xff] %v1367_v21 }
 0x1cd   : > { %v1212_v33 = vpop.f32.mrb[14].mxu0  ;;  %v1372_v34 = vpop.f32.mrb[14].mxu1 }
 0x1ce   : > { %1503 = vst [vmem:[%s3707_s27 + $0x38] sm:$0xff] %v1212_v33  ;;  %1742 = vst [vmem:[%s3707_s27 + $0xb8] sm:$0xff] %v1212_v33  ;;  %v1214_v27 = vpop.f32.mrb[15].mxu0  ;;  %v1374_v28 = vpop.f32.mrb[15].mxu1 }
 0x1cf   : > { %1535 = vst [vmem:[%s3707_s27 + $0x238] sm:$0xff] %v1372_v34  ;;  %1774 = vst [vmem:[%s3707_s27 + $0x2b8] sm:$0xff] %v1372_v34 }
 0x1d1   : > { %v1217_v16 = vpop.f32.mrb[16].mxu0  ;;  %v1377_v57 = vpop.f32.mrb[16].mxu1 }
 0x1d2   : > { %1504 = vst [vmem:[%s3707_s27 + $0x40] sm:$0xff] %v1217_v16  ;;  %1743 = vst [vmem:[%s3707_s27 + $0xc0] sm:$0xff] %v1217_v16  ;;  %v1219_v32 = vpop.f32.mrb[17].mxu0  ;;  %v1379_v36 = vpop.f32.mrb[17].mxu1 }
 0x1d3   : > { %1536 = vst [vmem:[%s3707_s27 + $0x240] sm:$0xff] %v1377_v57  ;;  %1775 = vst [vmem:[%s3707_s27 + $0x2c0] sm:$0xff] %v1377_v57 }
 0x1d5   : > { %v1222_v39 = vpop.f32.mrb[18].mxu0  ;;  %v1382_v40 = vpop.f32.mrb[18].mxu1 }
 0x1d6   : > { %1505 = vst [vmem:[%s3707_s27 + $0x48] sm:$0xff] %v1222_v39  ;;  %1744 = vst [vmem:[%s3707_s27 + $0xc8] sm:$0xff] %v1222_v39  ;;  %v1224_v0 = vpop.f32.mrb[19].mxu0  ;;  %v1384_v43 = vpop.f32.mrb[19].mxu1 }
 0x1d7   : > { %1537 = vst [vmem:[%s3707_s27 + $0x248] sm:$0xff] %v1382_v40  ;;  %1776 = vst [vmem:[%s3707_s27 + $0x2c8] sm:$0xff] %v1382_v40 }
 0x1d9   : > { %v1227_v41 = vpop.f32.mrb[20].mxu0  ;;  %v1387_v56 = vpop.f32.mrb[20].mxu1 }
 0x1da   : > { %1506 = vst [vmem:[%s3707_s27 + $0x50] sm:$0xff] %v1227_v41  ;;  %1745 = vst [vmem:[%s3707_s27 + $0xd0] sm:$0xff] %v1227_v41  ;;  %v1229_v42 = vpop.f32.mrb[21].mxu0  ;;  %v1389_v63 = vpop.f32.mrb[21].mxu1 }
 0x1db   : > { %1538 = vst [vmem:[%s3707_s27 + $0x250] sm:$0xff] %v1387_v56  ;;  %1777 = vst [vmem:[%s3707_s27 + $0x2d0] sm:$0xff] %v1387_v56 }
 0x1dd   : > { %v1232_v62 = vpop.f32.mrb[22].mxu0  ;;  %v1392_v38 = vpop.f32.mrb[22].mxu1 }
 0x1de   : > { %1507 = vst [vmem:[%s3707_s27 + $0x58] sm:$0xff] %v1232_v62  ;;  %1746 = vst [vmem:[%s3707_s27 + $0xd8] sm:$0xff] %v1232_v62  ;;  %v1234_v11 = vpop.f32.mrb[23].mxu0  ;;  %v1394_v46 = vpop.f32.mrb[23].mxu1 }
 0x1df   : > { %1539 = vst [vmem:[%s3707_s27 + $0x258] sm:$0xff] %v1392_v38  ;;  %1778 = vst [vmem:[%s3707_s27 + $0x2d8] sm:$0xff] %v1392_v38 }
 0x1e1   : > { %v1237_v47 = vpop.f32.mrb[24].mxu0  ;;  %v1397_v58 = vpop.f32.mrb[24].mxu1 }
 0x1e2   : > { %1508 = vst [vmem:[%s3707_s27 + $0x60] sm:$0xff] %v1237_v47  ;;  %1747 = vst [vmem:[%s3707_s27 + $0xe0] sm:$0xff] %v1237_v47  ;;  %v1239_v15 = vpop.f32.mrb[25].mxu0  ;;  %v1399_v37 = vpop.f32.mrb[25].mxu1 }
 0x1e3   : > { %1540 = vst [vmem:[%s3707_s27 + $0x260] sm:$0xff] %v1397_v58  ;;  %1779 = vst [vmem:[%s3707_s27 + $0x2e0] sm:$0xff] %v1397_v58 }
 0x1e5   : > { %v1242_v61 = vpop.f32.mrb[26].mxu0  ;;  %v1402_v30 = vpop.f32.mrb[26].mxu1 }
 0x1e6   : > { %1509 = vst [vmem:[%s3707_s27 + $0x68] sm:$0xff] %v1242_v61  ;;  %1748 = vst [vmem:[%s3707_s27 + $0xe8] sm:$0xff] %v1242_v61  ;;  %v1244_v48 = vpop.f32.mrb[27].mxu0  ;;  %v1404_v49 = vpop.f32.mrb[27].mxu1 }
 0x1e7   : > { %1541 = vst [vmem:[%s3707_s27 + $0x268] sm:$0xff] %v1402_v30  ;;  %1780 = vst [vmem:[%s3707_s27 + $0x2e8] sm:$0xff] %v1402_v30 }
 0x1e9   : > { %v1247_v52 = vpop.f32.mrb[28].mxu0  ;;  %v1407_v35 = vpop.f32.mrb[28].mxu1 }
 0x1ea   : > { %1510 = vst [vmem:[%s3707_s27 + $0x70] sm:$0xff] %v1247_v52  ;;  %1749 = vst [vmem:[%s3707_s27 + $0xf0] sm:$0xff] %v1247_v52  ;;  %v1249_v59 = vpop.f32.mrb[29].mxu0  ;;  %v1409_v60 = vpop.f32.mrb[29].mxu1 }
 0x1eb   : > { %1542 = vst [vmem:[%s3707_s27 + $0x270] sm:$0xff] %v1407_v35  ;;  %1781 = vst [vmem:[%s3707_s27 + $0x2f0] sm:$0xff] %v1407_v35 }
 0x1ed   : > { %v1252_v10 = vpop.f32.mrb[30].mxu0  ;;  %v1412_v54 = vpop.f32.mrb[30].mxu1 }
 0x1ee   : > { %1511 = vst [vmem:[%s3707_s27 + $0x78] sm:$0xff] %v1252_v10  ;;  %1750 = vst [vmem:[%s3707_s27 + $0xf8] sm:$0xff] %v1252_v10  ;;  %v1254_v55 = vpop.f32.mrb[31].mxu0  ;;  %v1414_v3 = vpop.f32.mrb[31].mxu1 }
 0x1ef   : > { %1543 = vst [vmem:[%s3707_s27 + $0x278] sm:$0xff] %v1412_v54  ;;  %1782 = vst [vmem:[%s3707_s27 + $0x2f8] sm:$0xff] %v1412_v54 }
 0x1f1   : > { %v1257_v4 = vpop.f32.mrb[32].mxu0  ;;  %v1417_v51 = vpop.f32.mrb[32].mxu1 }
 0x1f2   : > { %1512 = vst [vmem:[%s3707_s27 + $0x100] sm:$0xff] %v1257_v4  ;;  %1751 = vst [vmem:[%s3707_s27 + $0x180] sm:$0xff] %v1257_v4  ;;  %v1259_v31 = vpop.f32.mrb[33].mxu0  ;;  %v1419_v25 = vpop.f32.mrb[33].mxu1 }
 0x1f3   : > { %1544 = vst [vmem:[%s3707_s27 + $0x300] sm:$0xff] %v1417_v51  ;;  %1783 = vst [vmem:[%s3707_s27 + $0x380] sm:$0xff] %v1417_v51 }
 0x1f5   : > { %v1262_v12 = vpop.f32.mrb[34].mxu0  ;;  %v1422_v13 = vpop.f32.mrb[34].mxu1 }
 0x1f6   : > { %1513 = vst [vmem:[%s3707_s27 + $0x108] sm:$0xff] %v1262_v12  ;;  %1752 = vst [vmem:[%s3707_s27 + $0x188] sm:$0xff] %v1262_v12  ;;  %v1264_v29 = vpop.f32.mrb[35].mxu0  ;;  %v1424_v44 = vpop.f32.mrb[35].mxu1 }
 0x1f7   : > { %1545 = vst [vmem:[%s3707_s27 + $0x308] sm:$0xff] %v1422_v13  ;;  %1784 = vst [vmem:[%s3707_s27 + $0x388] sm:$0xff] %v1422_v13 }
 0x1f9   : > { %v1267_v14 = vpop.f32.mrb[36].mxu0  ;;  %v1427_v1 = vpop.f32.mrb[36].mxu1 }
 0x1fa   : > { %1514 = vst [vmem:[%s3707_s27 + $0x110] sm:$0xff] %v1267_v14  ;;  %1753 = vst [vmem:[%s3707_s27 + $0x190] sm:$0xff] %v1267_v14  ;;  %v1269_v2 = vpop.f32.mrb[37].mxu0  ;;  %v1429_v20 = vpop.f32.mrb[37].mxu1 }
 0x1fb   : > { %1546 = vst [vmem:[%s3707_s27 + $0x310] sm:$0xff] %v1427_v1  ;;  %1785 = vst [vmem:[%s3707_s27 + $0x390] sm:$0xff] %v1427_v1 }
 0x1fd   : > { %v1272_v23 = vpop.f32.mrb[38].mxu0  ;;  %v1432_v53 = vpop.f32.mrb[38].mxu1 }
 0x1fe   : > { %1515 = vst [vmem:[%s3707_s27 + $0x118] sm:$0xff] %v1272_v23  ;;  %1754 = vst [vmem:[%s3707_s27 + $0x198] sm:$0xff] %v1272_v23  ;;  %v1274_v18 = vpop.f32.mrb[39].mxu0  ;;  %v1434_v19 = vpop.f32.mrb[39].mxu1 }
 0x1ff   : > { %1547 = vst [vmem:[%s3707_s27 + $0x318] sm:$0xff] %v1432_v53  ;;  %1786 = vst [vmem:[%s3707_s27 + $0x398] sm:$0xff] %v1432_v53 }
 0x201   : > { %v1277_v7 = vpop.f32.mrb[40].mxu0  ;;  %v1437_v9 = vpop.f32.mrb[40].mxu1 }
 0x202   : > { %1516 = vst [vmem:[%s3707_s27 + $0x120] sm:$0xff] %v1277_v7  ;;  %1755 = vst [vmem:[%s3707_s27 + $0x1a0] sm:$0xff] %v1277_v7  ;;  %v1279_v5 = vpop.f32.mrb[41].mxu0  ;;  %v1439_v6 = vpop.f32.mrb[41].mxu1 }
 0x203   : > { %1548 = vst [vmem:[%s3707_s27 + $0x320] sm:$0xff] %v1437_v9  ;;  %1787 = vst [vmem:[%s3707_s27 + $0x3a0] sm:$0xff] %v1437_v9 }
 0x205   : > { %v1282_v8 = vpop.f32.mrb[42].mxu0  ;;  %v1442_v45 = vpop.f32.mrb[42].mxu1 }
 0x206   : > { %1517 = vst [vmem:[%s3707_s27 + $0x128] sm:$0xff] %v1282_v8  ;;  %1756 = vst [vmem:[%s3707_s27 + $0x1a8] sm:$0xff] %v1282_v8  ;;  %v1284_v17 = vpop.f32.mrb[43].mxu0  ;;  %v1444_v50 = vpop.f32.mrb[43].mxu1 }
 0x207   : > { %1549 = vst [vmem:[%s3707_s27 + $0x328] sm:$0xff] %v1442_v45  ;;  %1788 = vst [vmem:[%s3707_s27 + $0x3a8] sm:$0xff] %v1442_v45 }
 0x209   : > { %v1287_v26 = vpop.f32.mrb[44].mxu0  ;;  %v1447_v21 = vpop.f32.mrb[44].mxu1 }
 0x20a   : > { %1518 = vst [vmem:[%s3707_s27 + $0x130] sm:$0xff] %v1287_v26  ;;  %1757 = vst [vmem:[%s3707_s27 + $0x1b0] sm:$0xff] %v1287_v26  ;;  %v1289_v22 = vpop.f32.mrb[45].mxu0  ;;  %v1449_v24 = vpop.f32.mrb[45].mxu1 }
 0x20b   : > { %1550 = vst [vmem:[%s3707_s27 + $0x330] sm:$0xff] %v1447_v21  ;;  %1789 = vst [vmem:[%s3707_s27 + $0x3b0] sm:$0xff] %v1447_v21 }
 0x20d   : > { %v1292_v33 = vpop.f32.mrb[46].mxu0  ;;  %v1452_v34 = vpop.f32.mrb[46].mxu1 }
 0x20e   : > { %1519 = vst [vmem:[%s3707_s27 + $0x138] sm:$0xff] %v1292_v33  ;;  %1758 = vst [vmem:[%s3707_s27 + $0x1b8] sm:$0xff] %v1292_v33  ;;  %v1294_v27 = vpop.f32.mrb[47].mxu0  ;;  %v1454_v28 = vpop.f32.mrb[47].mxu1 }
 0x20f   : > { %1551 = vst [vmem:[%s3707_s27 + $0x338] sm:$0xff] %v1452_v34  ;;  %1790 = vst [vmem:[%s3707_s27 + $0x3b8] sm:$0xff] %v1452_v34 }
 0x211   : > { %v1297_v16 = vpop.f32.mrb[48].mxu0  ;;  %v1457_v57 = vpop.f32.mrb[48].mxu1 }
 0x212   : > { %1520 = vst [vmem:[%s3707_s27 + $0x140] sm:$0xff] %v1297_v16  ;;  %1759 = vst [vmem:[%s3707_s27 + $0x1c0] sm:$0xff] %v1297_v16  ;;  %v1299_v32 = vpop.f32.mrb[49].mxu0  ;;  %v1459_v36 = vpop.f32.mrb[49].mxu1 }
 0x213   : > { %1552 = vst [vmem:[%s3707_s27 + $0x340] sm:$0xff] %v1457_v57  ;;  %1791 = vst [vmem:[%s3707_s27 + $0x3c0] sm:$0xff] %v1457_v57 }
 0x215   : > { %v1302_v39 = vpop.f32.mrb[50].mxu0  ;;  %v1462_v40 = vpop.f32.mrb[50].mxu1 }
 0x216   : > { %1521 = vst [vmem:[%s3707_s27 + $0x148] sm:$0xff] %v1302_v39  ;;  %1760 = vst [vmem:[%s3707_s27 + $0x1c8] sm:$0xff] %v1302_v39  ;;  %v1304_v0 = vpop.f32.mrb[51].mxu0  ;;  %v1464_v43 = vpop.f32.mrb[51].mxu1 }
 0x217   : > { %1553 = vst [vmem:[%s3707_s27 + $0x348] sm:$0xff] %v1462_v40  ;;  %1792 = vst [vmem:[%s3707_s27 + $0x3c8] sm:$0xff] %v1462_v40 }
 0x219   : > { %v1307_v41 = vpop.f32.mrb[52].mxu0  ;;  %v1467_v56 = vpop.f32.mrb[52].mxu1 }
 0x21a   : > { %1522 = vst [vmem:[%s3707_s27 + $0x150] sm:$0xff] %v1307_v41  ;;  %1761 = vst [vmem:[%s3707_s27 + $0x1d0] sm:$0xff] %v1307_v41  ;;  %v1309_v42 = vpop.f32.mrb[53].mxu0  ;;  %v1469_v63 = vpop.f32.mrb[53].mxu1 }
 0x21b   : > { %1554 = vst [vmem:[%s3707_s27 + $0x350] sm:$0xff] %v1467_v56  ;;  %1793 = vst [vmem:[%s3707_s27 + $0x3d0] sm:$0xff] %v1467_v56 }
 0x21d   : > { %v1312_v62 = vpop.f32.mrb[54].mxu0  ;;  %v1472_v38 = vpop.f32.mrb[54].mxu1 }
 0x21e   : > { %1523 = vst [vmem:[%s3707_s27 + $0x158] sm:$0xff] %v1312_v62  ;;  %1762 = vst [vmem:[%s3707_s27 + $0x1d8] sm:$0xff] %v1312_v62  ;;  %v1314_v11 = vpop.f32.mrb[55].mxu0  ;;  %v1474_v46 = vpop.f32.mrb[55].mxu1 }
 0x21f   : > { %1555 = vst [vmem:[%s3707_s27 + $0x358] sm:$0xff] %v1472_v38  ;;  %1794 = vst [vmem:[%s3707_s27 + $0x3d8] sm:$0xff] %v1472_v38 }
 0x221   : > { %v1317_v47 = vpop.f32.mrb[56].mxu0  ;;  %v1477_v58 = vpop.f32.mrb[56].mxu1 }
 0x222   : > { %1524 = vst [vmem:[%s3707_s27 + $0x160] sm:$0xff] %v1317_v47  ;;  %1763 = vst [vmem:[%s3707_s27 + $0x1e0] sm:$0xff] %v1317_v47  ;;  %v1319_v15 = vpop.f32.mrb[57].mxu0  ;;  %v1479_v37 = vpop.f32.mrb[57].mxu1 }
 0x223   : > { %1556 = vst [vmem:[%s3707_s27 + $0x360] sm:$0xff] %v1477_v58  ;;  %1795 = vst [vmem:[%s3707_s27 + $0x3e0] sm:$0xff] %v1477_v58 }
 0x225   : > { %v1322_v61 = vpop.f32.mrb[58].mxu0  ;;  %v1482_v30 = vpop.f32.mrb[58].mxu1 }
 0x226   : > { %1525 = vst [vmem:[%s3707_s27 + $0x168] sm:$0xff] %v1322_v61  ;;  %1764 = vst [vmem:[%s3707_s27 + $0x1e8] sm:$0xff] %v1322_v61  ;;  %v1324_v48 = vpop.f32.mrb[59].mxu0  ;;  %v1484_v49 = vpop.f32.mrb[59].mxu1 }
 0x227   : > { %1557 = vst [vmem:[%s3707_s27 + $0x368] sm:$0xff] %v1482_v30  ;;  %1796 = vst [vmem:[%s3707_s27 + $0x3e8] sm:$0xff] %v1482_v30 }
 0x229   : > { %v1327_v52 = vpop.f32.mrb[60].mxu0  ;;  %v1487_v35 = vpop.f32.mrb[60].mxu1 }
 0x22a   : > { %1526 = vst [vmem:[%s3707_s27 + $0x170] sm:$0xff] %v1327_v52  ;;  %1765 = vst [vmem:[%s3707_s27 + $0x1f0] sm:$0xff] %v1327_v52  ;;  %v1329_v59 = vpop.f32.mrb[61].mxu0  ;;  %v1489_v60 = vpop.f32.mrb[61].mxu1 }
 0x22b   : > { %1558 = vst [vmem:[%s3707_s27 + $0x370] sm:$0xff] %v1487_v35  ;;  %1797 = vst [vmem:[%s3707_s27 + $0x3f0] sm:$0xff] %v1487_v35 }
 0x22d   : > { %v1332_v10 = vpop.f32.mrb[62].mxu0  ;;  %v1492_v54 = vpop.f32.mrb[62].mxu1 }
 0x22e   : > { %1527 = vst [vmem:[%s3707_s27 + $0x178] sm:$0xff] %v1332_v10  ;;  %1766 = vst [vmem:[%s3707_s27 + $0x1f8] sm:$0xff] %v1332_v10  ;;  %v1334_v55 = vpop.f32.mrb[63].mxu0  ;;  %v1494_v3 = vpop.f32.mrb[63].mxu1 }
 0x22f   : > { %1559 = vst [vmem:[%s3707_s27 + $0x378] sm:$0xff] %v1492_v54  ;;  %1798 = vst [vmem:[%s3707_s27 + $0x3f8] sm:$0xff] %v1492_v54 }
 0x230   : > { %2345 = shalt.err (!%p2342_p7)
}
 0x231   : > { %s2346_s25 = scalar_lea.hbm %s3838_s5, 16384  ;;  %s2350_s29 = scalar_lea.hbm %s3890_s2, 32768 }
 0x232   : > { %p2347_p9 = scmp.ne.s32.totalorder %s3838_s5, %s2346_s25  ;;  %p2351_p5 = scmp.lt.u32.totalorder %s3838_s5, %s3890_s2 }
 0x233   : > { %p2352_p11 = scmp.lt.u32.totalorder %s2350_s29, %s2346_s25  ;;  %p2354_p4 = scmp.lt.u32.totalorder %s2346_s25, %s3838_s5 }
 0x234   : > { %p2348_p2 = pnand %p2347_p9, %p2521_p12 }
 0x235   : > { %p2353_p1 = por %p2352_p11, %p2351_p5 }
 0x236   : > { %p2349_p0 = pneg %p2348_p2 }
 0x237   : > { %p2355_p6 = por %p2354_p4, %p2353_p1 }
 0x239   : > { %p2356_p8 = pnand %p2355_p6, %p2349_p0 }
 0x23b   : > { %2359 = shalt.err (!%p2356_p8)
}
 0x23c   : > { %s2413_s15 = smov 128   ;;  %s2414_s17 = smov 8  }
 0x23d   : > { %1895 = dma.vmem_to_hbm [thread:$0]  (%p2521_p12), %s3840_s23, 16384, %s3838_s5, %s1626_s13, %s2413_s15, %s2413_s15, %s2414_s17  }
 0x23e PF: > { %s1655_s27 = sand.u32 1, %s2390_s9   ;;  %p4175_p10 = scmp.ne.s32.totalorder %s3986_s16, 0 }
 0x23f   : > { %p4176_p13 = scmp.ge.s32.totalorder %s2402_s12, 2  ;;  %s1656_s22 = scalar_lea.sflag [#allocation4], %s1655_s27 }
 0x241   : > { %p1906_p3 = pnand %p4176_p13, %p4175_p10 }
 0x243   : > { %2385 = dma.done.wait (!%p1906_p3), %s1656_s22, 16384  }
 0x244   : > { %2387 = vsyncadd (!%p1906_p3), %s1656_s22, 4294950912  ;;  %p16_p7 = scmp.ge.s32.totalorder %s2486_s21, 4   ;;  %s4177_s9 = smov %s2394_s10 }
 0x245   : > { %s4178_s10 = smov %s2398_s11  ;;  %s4179_s11 = smov %s2517_s8 }
 0x246   : > { %s4180_s12 = smov %s2486_s21  ;;  %18 = sbr.rel (!%p16_p7) target bundleno = 6 (0x6), region = 78 }
 0x24d   :  { %1661 = vsyncpa [#allocation3], 1 }
 0x24e   :  { %1663 = vsyncpa [#allocation3 + $0x1], 1 }
 0x24f   :  { %1664 = vsyncpa [#allocation6], 1 }
 0x250   :  { %1665 = vsyncpa [#allocation4], 1 }
 0x251   :  { %1667 = vsyncpa [#allocation4 + $0x1], 1 }

</bundles_post_ra>
